<compile_context>
chip_gen: v5e
topology: v5e:2x2
jax: 0.10.0
libtpu: 0.0.40
codegen_flags: <defaults>
</compile_context>

<pallas_src>
import functools

import jax
import jax.numpy as jnp
from jax.experimental import pallas as pl
from jax.experimental.pallas import tpu as pltpu

LANE = 128


def _ceil_to(n, m):
    return -(-n // m) * m


# ----------------------------------------------------------------------------
# Fused Pallas kernel: the entire forward pass for one batch tile.
# ----------------------------------------------------------------------------
def _fused_cnn_kernel(x_ref,
                      w1_ref, a1_ref,
                      w2_ref, a2_ref,
                      w3_ref, a3_ref,
                      fw1_ref, fb1_ref,
                      fw2_ref, fb2_ref,
                      fw3_ref, fb3_ref,
                      o_ref):
    """x_ref: (BT, C*T) f32.  Weights: bf16 full blocks.  Affines/biases: f32."""

    def mm(h, w_ref):
        # bf16 x bf16 MXU matmul with f32 accumulation.
        return jnp.dot(h.astype(w_ref.dtype), w_ref[...],
                       preferred_element_type=jnp.float32)

    def conv_block(h, w_ref, aff_ref):
        # Conv (structured matmul) -> +bias -> ReLU -> folded eval BatchNorm (Dropout=id).
        aff = aff_ref[...]                                    # (3, N) f32: bias/scale/shift
        acc = mm(h, w_ref) + aff[0:1, :]
        acc = jnp.maximum(acc, 0.0)
        return acc * aff[1:2, :] + aff[2:3, :]

    h = x_ref[...]                                            # (BT, C*T)
    h = conv_block(h, w1_ref, a1_ref)                         # conv_bandpass -> (BT, C*T*O1)
    h = conv_block(h, w2_ref, a2_ref)                         # conv_spatial  -> (BT, T*O2)
    h = conv_block(h, w3_ref, a3_ref)                         # conv_temporal -> (BT, F3P)
    h = jnp.maximum(mm(h, fw1_ref) + fb1_ref[...], 0.0)       # Linear+ReLU   -> (BT, D1P)
    h = jnp.maximum(mm(h, fw2_ref) + fb2_ref[...], 0.0)       # Linear+ReLU   -> (BT, D2P)
    o_ref[...] = mm(h, fw3_ref) + fb3_ref[...]                # Linear        -> (BT, D3P)


# ----------------------------------------------------------------------------
# One-time weight preparation: fold every conv into a structured matmul weight,
# pre-transpose / permute the FC weights, zero-pad widths to 128-lane multiples
# and cast matmul operands to bf16 (biases / BN affines stay f32).
# ----------------------------------------------------------------------------
def prepare_operands(p, C, W, KL, T):
    # The PyTorch module computes fcUnit with nTime == window_size, so T must equal W.
    assert T == W, "CNNModel ties nTime to window_size; fcUnit assumes T == W"
    O1, O2, O3 = 2 * C, 4 * C, 2 * C
    Tout = (T - KL) // 2 + 1
    pad_l = (W - 1) // 2                     # PyTorch 'same' left pad (asymmetric)
    f32, bf16 = jnp.float32, jnp.bfloat16

    # ---- conv_bandpass: Conv2d(1, O1, (1, W), padding='same') ----------------
    # y1[b, c, t, o] = sum_k x[b, c, t + k - pad_l] * w1[o, 0, 0, k]
    # -> channel-block-diagonal banded matrix:  (C*T) x (C*T*O1)
    w1m = p["w1"][:, 0, 0, :].T.astype(f32)                      # (W, O1)
    tp = jnp.arange(T)[:, None]                                  # source time t'
    tt = jnp.arange(T)[None, :]                                  # output time t
    k1 = tp - tt + pad_l
    band1 = jnp.where(((k1 >= 0) & (k1 < W))[:, :, None],
                      w1m[jnp.clip(k1, 0, W - 1)], 0.0)          # (T, T, O1)
    eyeC = jnp.eye(C, dtype=f32)
    # TODO(synk): Kronecker structure (I_C (x) band1) materialized densely; factor it for
    # large C*T so weight VMEM does not grow as (C*T)^2.
    W1 = (eyeC[:, None, :, None, None] *
          band1[None, :, None, :, :]).reshape(C * T, C * T * O1)
    s1, sh1 = p["bn1"]
    A1 = jnp.stack([jnp.tile(p["b1"], C * T),
                    jnp.tile(s1, C * T),
                    jnp.tile(sh1, C * T)], axis=0)               # (3, C*T*O1)

    # ---- conv_spatial: Conv2d(O1, O2, (C, 1), stride=(C, 1)) -----------------
    # y2[b, t, o2] = sum_{c, o1} y1[b, c, t, o1] * w2[o2, o1, c, 0]
    # -> time-block-diagonal matrix:  (C*T*O1) x (T*O2)
    w2m = jnp.transpose(p["w2"][:, :, :, 0], (2, 1, 0)).astype(f32)   # (C, O1, O2)
    eyeT = jnp.eye(T, dtype=f32)
    W2 = (w2m[:, None, :, None, :] *
          eyeT[None, :, None, :, None]).reshape(C * T * O1, T * O2)
    s2, sh2 = p["bn2"]
    A2 = jnp.stack([jnp.tile(p["b2"], T), jnp.tile(s2, T), jnp.tile(sh2, T)], axis=0)

    # ---- conv_temporal: Conv2d(O2, O3, (1, KL), stride=(KL, 2)) --------------
    # y3[b, tau, o3] = sum_{o2, k} y2[b, 2*tau + k, o2] * w3[o3, o2, 0, k]
    # -> strided banded matrix (T*O2) x F3, zero-padded to F3P (lane multiple)
    w3m = jnp.transpose(p["w3"][:, :, 0, :], (1, 2, 0)).astype(f32)   # (O2, KL, O3)
    ti = jnp.arange(T)[:, None]
    taui = jnp.arange(Tout)[None, :]
    k3 = ti - 2 * taui
    W3 = jnp.where(((k3 >= 0) & (k3 < KL))[None, :, :, None],
                   w3m[:, jnp.clip(k3, 0, KL - 1), :], 0.0)      # (O2, T, Tout, O3)
    W3 = jnp.transpose(W3, (1, 0, 2, 3)).reshape(T * O2, Tout * O3)
    F3 = Tout * O3
    F3P = _ceil_to(F3, LANE)
    W3 = jnp.pad(W3, ((0, 0), (0, F3P - F3)))
    s3, sh3 = p["bn3"]
    A3 = jnp.pad(jnp.stack([jnp.tile(p["b3"], Tout),
                            jnp.tile(s3, Tout),
                            jnp.tile(sh3, Tout)], axis=0),
                 ((0, 0), (0, F3P - F3)))                         # padded cols: 0*x+0 = 0

    # ---- linearOut: pre-transpose; permute fw1 rows from torch (o3, tau) order to the
    #      kernel's (tau, o3) conv-output order; zero-pad every in/out width to a lane
    #      multiple so the FC chain + final output are lane-dense (ReLU(0)=0 -> exact).
    D1, D2, D3 = p["fw1"].shape[0], p["fw2"].shape[0], p["fw3"].shape[0]
    D1P, D2P, D3P = _ceil_to(D1, LANE), _ceil_to(D2, LANE), _ceil_to(D3, LANE)
    FW1 = p["fw1"].T.reshape(O3, Tout, D1).transpose(1, 0, 2).reshape(F3, D1)
    FW1 = jnp.pad(FW1, ((0, F3P - F3), (0, D1P - D1)))
    FB1 = jnp.pad(p["fb1"], (0, D1P - D1))[None, :]
    FW2 = jnp.pad(p["fw2"].T, ((0, D1P - D1), (0, D2P - D2)))
    FB2 = jnp.pad(p["fb2"], (0, D2P - D2))[None, :]
    FW3 = jnp.pad(p["fw3"].T, ((0, D2P - D2), (0, D3P - D3)))
    FB3 = jnp.pad(p["fb3"], (0, D3P - D3))[None, :]

    # Matmul operands bf16 (MXU-native, halves weight VMEM + HBM->VMEM DMA);
    # bias / folded-BN affine stay f32 (applied to the f32 accumulator).
    return (W1.astype(bf16), A1.astype(f32),
            W2.astype(bf16), A2.astype(f32),
            W3.astype(bf16), A3.astype(f32),
            FW1.astype(bf16), FB1.astype(f32),
            FW2.astype(bf16), FB2.astype(f32),
            FW3.astype(bf16), FB3.astype(f32))


# ----------------------------------------------------------------------------
# Batch tiling heuristic:
#   - tiny B: one grid step over the whole batch (block == full array, no pad);
#   - otherwise: largest multiple-of-8 tile <= cap that divides B (no host-side
#     pad copy) while keeping >= 2 tiles for B >= 16 (v7x megacore sharding);
#   - fallback: 8-aligned tile with a padded last step.
# ----------------------------------------------------------------------------
def _pick_batch_tile(B, cap=512):
    if B <= 8:
        return B, B
    upper = min(cap, B)
    if B >= 16:
        upper = min(upper, -(-B // 2))        # >= 2 tiles -> both v7x TensorCores busy
    upper = max(8, (upper // 8) * 8)
    for bt in range(upper, 7, -8):
        if B % bt == 0:
            return bt, B
    bt = upper
    return bt, -(-B // bt) * bt               # rare fallback: pad last tile


# ----------------------------------------------------------------------------
# Forward pass: a single pallas_call, batch-tiled grid.
# ----------------------------------------------------------------------------
def cnn_forward(x, ops, C, W, KL, *, batch_tile=512, single_buffer_weights=True):
    """x: (B, nChan=C, nTime=T) float32 -> (B, C)."""
    B, Cx, T = x.shape
    assert Cx == C and T == W
    D3 = C
    FB3 = ops[-1]
    D3P = FB3.shape[1]                        # lane-dense (>=128) output width

    # Row-major (B, C, T) -> (B, C*T) is a free, layout-preserving reshape.
    x2d = x.reshape(B, C * T).astype(jnp.float32)

    BT, Bpad = _pick_batch_tile(B, batch_tile)
    nb = Bpad // BT
    if Bpad != B:
        # TODO(synk): a masked last-tile write would avoid this extra HBM copy; only hit
        # when no multiple-of-8 tile divides B.
        x2d = jnp.pad(x2d, ((0, Bpad - B), (0, 0)))

    def weight_spec(a):
        # Constant-index full block; single-buffered (never re-fetched) when supported.
        if single_buffer_weights:
            try:
                return pl.BlockSpec(a.shape, lambda i: (0, 0),
                                    pipeline_mode=pl.Buffered(1))
            except Exception:   # older jax: no pipeline_mode / Buffered
                pass
        return pl.BlockSpec(a.shape, lambda i: (0, 0))

    out = pl.pallas_call(
        _fused_cnn_kernel,
        out_shape=jax.ShapeDtypeStruct((Bpad, D3P), jnp.float32),
        grid=(nb,),
        in_specs=[pl.BlockSpec((BT, C * T), lambda i: (i, 0))]
                 + [weight_spec(a) for a in ops],
        out_specs=pl.BlockSpec((BT, D3P), lambda i: (i, 0)),
        compiler_params=pltpu.CompilerParams(
            dimension_semantics=("parallel",),
            vmem_limit_bytes=32 * 1024 * 1024),
    )(x2d, *ops)

    return out[:B, :D3]


# ----------------------------------------------------------------------------
# Parameter initialization (deterministic, synthetic, torch-layout)
# ----------------------------------------------------------------------------
def _bn_fold(key, n, eps=1e-5):
    k1, k2, k3, k4 = jax.random.split(key, 4)
    gamma = 0.5 + jax.random.uniform(k1, (n,), jnp.float32)
    beta = 0.1 * jax.random.normal(k2, (n,), jnp.float32)
    mean = 0.1 * jax.random.normal(k3, (n,), jnp.float32)
    var = 0.5 + jax.random.uniform(k4, (n,), jnp.float32)
    scale = gamma / jnp.sqrt(var + eps)
    shift = beta - mean * scale
    return scale, shift


def init_params(key, C, W, KL):
    O1, O2, O3 = 2 * C, 4 * C, 2 * C
    # Note: the PyTorch module computes fcSize with nTime = window_size, i.e. T == W.
    Tout = (W - KL) // 2 + 1
    fc_unit = O3 * 1 * Tout
    D1, D2, D3 = 100, 50, C
    ks = jax.random.split(key, 16)

    def nrm(k, shape, s=0.1):
        return s * jax.random.normal(k, shape, jnp.float32)

    return {
        # conv_bandpass: Conv2d(1, 2C, (1, W), padding='same')
        "w1": nrm(ks[0], (O1, 1, 1, W)), "b1": nrm(ks[1], (O1,)), "bn1": _bn_fold(ks[2], O1),
        # conv_spatial : Conv2d(2C, 4C, (C, 1), stride=(C, 1))
        "w2": nrm(ks[3], (O2, O1, C, 1)), "b2": nrm(ks[4], (O2,)), "bn2": _bn_fold(ks[5], O2),
        # conv_temporal: Conv2d(4C, 2C, (1, KL), stride=(KL, 2))
        "w3": nrm(ks[6], (O3, O2, 1, KL)), "b3": nrm(ks[7], (O3,)), "bn3": _bn_fold(ks[8], O3),
        # linearOut
        "fw1": nrm(ks[9], (D1, fc_unit)), "fb1": nrm(ks[10], (D1,)),
        "fw2": nrm(ks[11], (D2, D1)),     "fb2": nrm(ks[12], (D2,)),
        "fw3": nrm(ks[13], (D3, D2)),     "fb3": nrm(ks[14], (D3,)),
    }


# ----------------------------------------------------------------------------
# Pure-JAX reference (mirrors the PyTorch module in eval mode) for validation.
# ----------------------------------------------------------------------------
def reference_forward(x, p, C, W, KL):
    hp = jax.lax.Precision.HIGHEST
    B, _, T = x.shape
    pad_l = (W - 1) // 2
    xpad = jnp.pad(x, ((0, 0), (0, 0), (pad_l, (W - 1) - pad_l)))
    idx = jnp.arange(T)[:, None] + jnp.arange(W)[None, :]
    m1 = xpad[:, :, idx]                                            # (B, C, T, W)
    s1, sh1 = p["bn1"]
    y1 = jnp.einsum('bctw,ow->boct', m1, p["w1"][:, 0, 0, :], precision=hp) \
        + p["b1"][None, :, None, None]
    y1 = jnp.maximum(y1, 0.) * s1[None, :, None, None] + sh1[None, :, None, None]
    s2, sh2 = p["bn2"]
    y2 = jnp.einsum('boct,poc->bpt', y1, p["w2"][:, :, :, 0], precision=hp) \
        + p["b2"][None, :, None]
    y2 = jnp.maximum(y2, 0.) * s2[None, :, None] + sh2[None, :, None]
    Tout = (T - KL) // 2 + 1
    tidx = 2 * jnp.arange(Tout)[:, None] + jnp.arange(KL)[None, :]
    m3 = y2[:, :, tidx]                                             # (B, O2, Tout, KL)
    s3, sh3 = p["bn3"]
    y3 = jnp.einsum('bptk,qpk->bqt', m3, p["w3"][:, :, 0, :], precision=hp) \
        + p["b3"][None, :, None]
    y3 = jnp.maximum(y3, 0.) * s3[None, :, None] + sh3[None, :, None]
    feat = y3.reshape(B, -1)
    h1 = jnp.maximum(jnp.dot(feat, p["fw1"].T, precision=hp) + p["fb1"], 0.)
    h2 = jnp.maximum(jnp.dot(h1, p["fw2"].T, precision=hp) + p["fb2"], 0.)
    return jnp.dot(h2, p["fw3"].T, precision=hp) + p["fb3"]


# ----------------------------------------------------------------------------
if __name__ == "__main__":
    B = 2      # batch
    C = 4      # input_size  (nChan)
    W = 16     # window_size (nTime == conv_bandpass kernel width)
    KL = 3     # kernel_length

    key = jax.random.PRNGKey(0)
    k_param, k_x = jax.random.split(key)
    params = init_params(k_param, C, W, KL)
    x = jax.random.normal(k_x, (B, C, W), jnp.float32)             # (batch, nChan, nTime)

    ops = prepare_operands(params, C, W, KL, T=W)

    fwd = jax.jit(functools.partial(cnn_forward, C=C, W=W, KL=KL))
    try:
        out = jax.block_until_ready(fwd(x, ops))
    except Exception:
        # Compatibility fallback: default double-buffered constant weight blocks.
        fwd = jax.jit(functools.partial(cnn_forward, C=C, W=W, KL=KL,
                                        single_buffer_weights=False))
        out = jax.block_until_ready(fwd(x, ops))

    assert out.shape == (B, C), out.shape
    assert bool(jnp.all(jnp.isfinite(out)))

    ref = reference_forward(x, params, C, W, KL)
    err = float(jnp.max(jnp.abs(out - ref)))
    # bf16 matmul operands (f32 accumulation): tolerance absorbs the precision change.
    assert err < 2e-2, f"mismatch vs reference: max|diff|={err}"
    print("KERNEL_OK")
</pallas_src>

<mosaic_0001>
module attributes {stable_mosaic.version = 11 : i64} {
  func.func @_fused_cnn_kernel(%arg0: i32, %arg1: memref<2x64xf32, #tpu.memory_space<vmem>>, %arg2: memref<64x512xbf16, #tpu.memory_space<vmem>>, %arg3: memref<3x512xf32, #tpu.memory_space<vmem>>, %arg4: memref<512x256xbf16, #tpu.memory_space<vmem>>, %arg5: memref<3x256xf32, #tpu.memory_space<vmem>>, %arg6: memref<256x128xbf16, #tpu.memory_space<vmem>>, %arg7: memref<3x128xf32, #tpu.memory_space<vmem>>, %arg8: memref<128x128xbf16, #tpu.memory_space<vmem>>, %arg9: memref<1x128xf32, #tpu.memory_space<vmem>>, %arg10: memref<128x128xbf16, #tpu.memory_space<vmem>>, %arg11: memref<1x128xf32, #tpu.memory_space<vmem>>, %arg12: memref<128x128xbf16, #tpu.memory_space<vmem>>, %arg13: memref<1x128xf32, #tpu.memory_space<vmem>>, %arg14: memref<2x128xf32, #tpu.memory_space<vmem>>) attributes {dimension_semantics = [#tpu.dimension_semantics<parallel>], iteration_bounds = array<i64: 1>, scalar_prefetch = 0 : i64, scratch_operands = 0 : i64, tpu.core_type = #tpu.core_type<tc>, window_params = [{transform_indices = @transform_0, window_bounds = array<i64: 2, 64>}, {pipeline_mode = #tpu.pipeline_mode<synchronous>, transform_indices = @transform_1, window_bounds = array<i64: 64, 512>}, {pipeline_mode = #tpu.pipeline_mode<synchronous>, transform_indices = @transform_2, window_bounds = array<i64: 3, 512>}, {pipeline_mode = #tpu.pipeline_mode<synchronous>, transform_indices = @transform_3, window_bounds = array<i64: 512, 256>}, {pipeline_mode = #tpu.pipeline_mode<synchronous>, transform_indices = @transform_4, window_bounds = array<i64: 3, 256>}, {pipeline_mode = #tpu.pipeline_mode<synchronous>, transform_indices = @transform_5, window_bounds = array<i64: 256, 128>}, {pipeline_mode = #tpu.pipeline_mode<synchronous>, transform_indices = @transform_6, window_bounds = array<i64: 3, 128>}, {pipeline_mode = #tpu.pipeline_mode<synchronous>, transform_indices = @transform_7, window_bounds = array<i64: 128, 128>}, {pipeline_mode = #tpu.pipeline_mode<synchronous>, transform_indices = @transform_8, window_bounds = array<i64: 1, 128>}, {pipeline_mode = #tpu.pipeline_mode<synchronous>, transform_indices = @transform_9, window_bounds = array<i64: 128, 128>}, {pipeline_mode = #tpu.pipeline_mode<synchronous>, transform_indices = @transform_10, window_bounds = array<i64: 1, 128>}, {pipeline_mode = #tpu.pipeline_mode<synchronous>, transform_indices = @transform_11, window_bounds = array<i64: 128, 128>}, {pipeline_mode = #tpu.pipeline_mode<synchronous>, transform_indices = @transform_12, window_bounds = array<i64: 1, 128>}, {transform_indices = @transform_13, window_bounds = array<i64: 2, 128>}]} {
    %c0 = arith.constant 0 : index
    %c0_0 = arith.constant 0 : index
    %0 = vector.load %arg1[%c0, %c0_0] : memref<2x64xf32, #tpu.memory_space<vmem>>, vector<2x64xf32>
    %c0_1 = arith.constant 0 : index
    %c0_2 = arith.constant 0 : index
    %1 = vector.load %arg3[%c0_1, %c0_2] : memref<3x512xf32, #tpu.memory_space<vmem>>, vector<3x512xf32>
    %2 = arith.truncf %0 : vector<2x64xf32> to vector<2x64xbf16>
    %c0_3 = arith.constant 0 : index
    %c0_4 = arith.constant 0 : index
    %3 = vector.load %arg2[%c0_3, %c0_4] : memref<64x512xbf16, #tpu.memory_space<vmem>>, vector<64x512xbf16>
    %cst = arith.constant dense<0.000000e+00> : vector<2x512xf32>
    %4 = tpu.matmul %2, %3, %cst {dimension_numbers = #tpu.dot_dimension_numbers<[1], [0], [0], [1], [0, 0, 1, 1], [], []>} : vector<2x64xbf16>, vector<64x512xbf16>, vector<2x512xf32> -> vector<2x512xf32>
    %5 = vector.extract_strided_slice %1 {offsets = [0, 0], sizes = [1, 512], strides = [1, 1]} : vector<3x512xf32> to vector<1x512xf32>
    %6 = vector.broadcast %5 : vector<1x512xf32> to vector<2x512xf32>
    %7 = arith.addf %4, %6 : vector<2x512xf32>
    %cst_5 = arith.constant 0.000000e+00 : f32
    %8 = vector.broadcast %cst_5 : f32 to vector<2x512xf32>
    %9 = arith.maximumf %7, %8 : vector<2x512xf32>
    %10 = vector.extract_strided_slice %1 {offsets = [1, 0], sizes = [1, 512], strides = [1, 1]} : vector<3x512xf32> to vector<1x512xf32>
    %11 = vector.broadcast %10 : vector<1x512xf32> to vector<2x512xf32>
    %12 = arith.mulf %9, %11 : vector<2x512xf32>
    %13 = vector.extract_strided_slice %1 {offsets = [2, 0], sizes = [1, 512], strides = [1, 1]} : vector<3x512xf32> to vector<1x512xf32>
    %14 = vector.broadcast %13 : vector<1x512xf32> to vector<2x512xf32>
    %15 = arith.addf %12, %14 : vector<2x512xf32>
    %c0_6 = arith.constant 0 : index
    %c0_7 = arith.constant 0 : index
    %16 = vector.load %arg5[%c0_6, %c0_7] : memref<3x256xf32, #tpu.memory_space<vmem>>, vector<3x256xf32>
    %17 = arith.truncf %15 : vector<2x512xf32> to vector<2x512xbf16>
    %c0_8 = arith.constant 0 : index
    %c0_9 = arith.constant 0 : index
    %18 = vector.load %arg4[%c0_8, %c0_9] : memref<512x256xbf16, #tpu.memory_space<vmem>>, vector<512x256xbf16>
    %cst_10 = arith.constant dense<0.000000e+00> : vector<2x256xf32>
    %19 = tpu.matmul %17, %18, %cst_10 {dimension_numbers = #tpu.dot_dimension_numbers<[1], [0], [0], [1], [0, 0, 1, 1], [], []>} : vector<2x512xbf16>, vector<512x256xbf16>, vector<2x256xf32> -> vector<2x256xf32>
    %20 = vector.extract_strided_slice %16 {offsets = [0, 0], sizes = [1, 256], strides = [1, 1]} : vector<3x256xf32> to vector<1x256xf32>
    %21 = vector.broadcast %20 : vector<1x256xf32> to vector<2x256xf32>
    %22 = arith.addf %19, %21 : vector<2x256xf32>
    %cst_11 = arith.constant 0.000000e+00 : f32
    %23 = vector.broadcast %cst_11 : f32 to vector<2x256xf32>
    %24 = arith.maximumf %22, %23 : vector<2x256xf32>
    %25 = vector.extract_strided_slice %16 {offsets = [1, 0], sizes = [1, 256], strides = [1, 1]} : vector<3x256xf32> to vector<1x256xf32>
    %26 = vector.broadcast %25 : vector<1x256xf32> to vector<2x256xf32>
    %27 = arith.mulf %24, %26 : vector<2x256xf32>
    %28 = vector.extract_strided_slice %16 {offsets = [2, 0], sizes = [1, 256], strides = [1, 1]} : vector<3x256xf32> to vector<1x256xf32>
    %29 = vector.broadcast %28 : vector<1x256xf32> to vector<2x256xf32>
    %30 = arith.addf %27, %29 : vector<2x256xf32>
    %c0_12 = arith.constant 0 : index
    %c0_13 = arith.constant 0 : index
    %31 = vector.load %arg7[%c0_12, %c0_13] : memref<3x128xf32, #tpu.memory_space<vmem>>, vector<3x128xf32>
    %32 = arith.truncf %30 : vector<2x256xf32> to vector<2x256xbf16>
    %c0_14 = arith.constant 0 : index
    %c0_15 = arith.constant 0 : index
    %33 = vector.load %arg6[%c0_14, %c0_15] : memref<256x128xbf16, #tpu.memory_space<vmem>>, vector<256x128xbf16>
    %cst_16 = arith.constant dense<0.000000e+00> : vector<2x128xf32>
    %34 = tpu.matmul %32, %33, %cst_16 {dimension_numbers = #tpu.dot_dimension_numbers<[1], [0], [0], [1], [0, 0, 1, 1], [], []>} : vector<2x256xbf16>, vector<256x128xbf16>, vector<2x128xf32> -> vector<2x128xf32>
    %35 = vector.extract_strided_slice %31 {offsets = [0, 0], sizes = [1, 128], strides = [1, 1]} : vector<3x128xf32> to vector<1x128xf32>
    %36 = vector.broadcast %35 : vector<1x128xf32> to vector<2x128xf32>
    %37 = arith.addf %34, %36 : vector<2x128xf32>
    %cst_17 = arith.constant 0.000000e+00 : f32
    %38 = vector.broadcast %cst_17 : f32 to vector<2x128xf32>
    %39 = arith.maximumf %37, %38 : vector<2x128xf32>
    %40 = vector.extract_strided_slice %31 {offsets = [1, 0], sizes = [1, 128], strides = [1, 1]} : vector<3x128xf32> to vector<1x128xf32>
    %41 = vector.broadcast %40 : vector<1x128xf32> to vector<2x128xf32>
    %42 = arith.mulf %39, %41 : vector<2x128xf32>
    %43 = vector.extract_strided_slice %31 {offsets = [2, 0], sizes = [1, 128], strides = [1, 1]} : vector<3x128xf32> to vector<1x128xf32>
    %44 = vector.broadcast %43 : vector<1x128xf32> to vector<2x128xf32>
    %45 = arith.addf %42, %44 : vector<2x128xf32>
    %46 = arith.truncf %45 : vector<2x128xf32> to vector<2x128xbf16>
    %c0_18 = arith.constant 0 : index
    %c0_19 = arith.constant 0 : index
    %47 = vector.load %arg8[%c0_18, %c0_19] : memref<128x128xbf16, #tpu.memory_space<vmem>>, vector<128x128xbf16>
    %cst_20 = arith.constant dense<0.000000e+00> : vector<2x128xf32>
    %48 = tpu.matmul %46, %47, %cst_20 {dimension_numbers = #tpu.dot_dimension_numbers<[1], [0], [0], [1], [0, 0, 1, 1], [], []>} : vector<2x128xbf16>, vector<128x128xbf16>, vector<2x128xf32> -> vector<2x128xf32>
    %c0_21 = arith.constant 0 : index
    %c0_22 = arith.constant 0 : index
    %49 = vector.load %arg9[%c0_21, %c0_22] : memref<1x128xf32, #tpu.memory_space<vmem>>, vector<1x128xf32>
    %50 = vector.broadcast %49 : vector<1x128xf32> to vector<2x128xf32>
    %51 = arith.addf %48, %50 : vector<2x128xf32>
    %cst_23 = arith.constant 0.000000e+00 : f32
    %52 = vector.broadcast %cst_23 : f32 to vector<2x128xf32>
    %53 = arith.maximumf %51, %52 : vector<2x128xf32>
    %54 = arith.truncf %53 : vector<2x128xf32> to vector<2x128xbf16>
    %c0_24 = arith.constant 0 : index
    %c0_25 = arith.constant 0 : index
    %55 = vector.load %arg10[%c0_24, %c0_25] : memref<128x128xbf16, #tpu.memory_space<vmem>>, vector<128x128xbf16>
    %cst_26 = arith.constant dense<0.000000e+00> : vector<2x128xf32>
    %56 = tpu.matmul %54, %55, %cst_26 {dimension_numbers = #tpu.dot_dimension_numbers<[1], [0], [0], [1], [0, 0, 1, 1], [], []>} : vector<2x128xbf16>, vector<128x128xbf16>, vector<2x128xf32> -> vector<2x128xf32>
    %c0_27 = arith.constant 0 : index
    %c0_28 = arith.constant 0 : index
    %57 = vector.load %arg11[%c0_27, %c0_28] : memref<1x128xf32, #tpu.memory_space<vmem>>, vector<1x128xf32>
    %58 = vector.broadcast %57 : vector<1x128xf32> to vector<2x128xf32>
    %59 = arith.addf %56, %58 : vector<2x128xf32>
    %cst_29 = arith.constant 0.000000e+00 : f32
    %60 = vector.broadcast %cst_29 : f32 to vector<2x128xf32>
    %61 = arith.maximumf %59, %60 : vector<2x128xf32>
    %62 = arith.truncf %61 : vector<2x128xf32> to vector<2x128xbf16>
    %c0_30 = arith.constant 0 : index
    %c0_31 = arith.constant 0 : index
    %63 = vector.load %arg12[%c0_30, %c0_31] : memref<128x128xbf16, #tpu.memory_space<vmem>>, vector<128x128xbf16>
    %cst_32 = arith.constant dense<0.000000e+00> : vector<2x128xf32>
    %64 = tpu.matmul %62, %63, %cst_32 {dimension_numbers = #tpu.dot_dimension_numbers<[1], [0], [0], [1], [0, 0, 1, 1], [], []>} : vector<2x128xbf16>, vector<128x128xbf16>, vector<2x128xf32> -> vector<2x128xf32>
    %c0_33 = arith.constant 0 : index
    %c0_34 = arith.constant 0 : index
    %65 = vector.load %arg13[%c0_33, %c0_34] : memref<1x128xf32, #tpu.memory_space<vmem>>, vector<1x128xf32>
    %66 = vector.broadcast %65 : vector<1x128xf32> to vector<2x128xf32>
    %67 = arith.addf %64, %66 : vector<2x128xf32>
    %c0_35 = arith.constant 0 : index
    %c0_36 = arith.constant 0 : index
    %68 = vector.load %arg14[%c0_35, %c0_36] : memref<2x128xf32, #tpu.memory_space<vmem>>, vector<2x128xf32>
    tpu.vector_store %arg14[%c0_35, %c0_36], %67 {strides = array<i32>} : memref<2x128xf32, #tpu.memory_space<vmem>>, vector<2x128xf32>,
    return
  }
  func.func @transform_0(%arg0: i32) -> (i32, i32) {
    %c0_i32 = arith.constant 0 : i32
    %c0_i32_0 = arith.constant 0 : i32
    return %arg0, %c0_i32 : i32, i32
  }
  func.func @transform_1(%arg0: i32) -> (i32, i32) {
    %c0_i32 = arith.constant 0 : i32
    %c0_i32_0 = arith.constant 0 : i32
    %c0_i32_1 = arith.constant 0 : i32
    return %c0_i32, %c0_i32_0 : i32, i32
  }
  func.func @transform_2(%arg0: i32) -> (i32, i32) {
    %c0_i32 = arith.constant 0 : i32
    %c0_i32_0 = arith.constant 0 : i32
    %c0_i32_1 = arith.constant 0 : i32
    return %c0_i32, %c0_i32_0 : i32, i32
  }
  func.func @transform_3(%arg0: i32) -> (i32, i32) {
    %c0_i32 = arith.constant 0 : i32
    %c0_i32_0 = arith.constant 0 : i32
    %c0_i32_1 = arith.constant 0 : i32
    return %c0_i32, %c0_i32_0 : i32, i32
  }
  func.func @transform_4(%arg0: i32) -> (i32, i32) {
    %c0_i32 = arith.constant 0 : i32
    %c0_i32_0 = arith.constant 0 : i32
    %c0_i32_1 = arith.constant 0 : i32
    return %c0_i32, %c0_i32_0 : i32, i32
  }
  func.func @transform_5(%arg0: i32) -> (i32, i32) {
    %c0_i32 = arith.constant 0 : i32
    %c0_i32_0 = arith.constant 0 : i32
    %c0_i32_1 = arith.constant 0 : i32
    return %c0_i32, %c0_i32_0 : i32, i32
  }
  func.func @transform_6(%arg0: i32) -> (i32, i32) {
    %c0_i32 = arith.constant 0 : i32
    %c0_i32_0 = arith.constant 0 : i32
    %c0_i32_1 = arith.constant 0 : i32
    return %c0_i32, %c0_i32_0 : i32, i32
  }
  func.func @transform_7(%arg0: i32) -> (i32, i32) {
    %c0_i32 = arith.constant 0 : i32
    %c0_i32_0 = arith.constant 0 : i32
    %c0_i32_1 = arith.constant 0 : i32
    return %c0_i32, %c0_i32_0 : i32, i32
  }
  func.func @transform_8(%arg0: i32) -> (i32, i32) {
    %c0_i32 = arith.constant 0 : i32
    %c0_i32_0 = arith.constant 0 : i32
    %c0_i32_1 = arith.constant 0 : i32
    return %c0_i32, %c0_i32_0 : i32, i32
  }
  func.func @transform_9(%arg0: i32) -> (i32, i32) {
    %c0_i32 = arith.constant 0 : i32
    %c0_i32_0 = arith.constant 0 : i32
    %c0_i32_1 = arith.constant 0 : i32
    return %c0_i32, %c0_i32_0 : i32, i32
  }
  func.func @transform_10(%arg0: i32) -> (i32, i32) {
    %c0_i32 = arith.constant 0 : i32
    %c0_i32_0 = arith.constant 0 : i32
    %c0_i32_1 = arith.constant 0 : i32
    return %c0_i32, %c0_i32_0 : i32, i32
  }
  func.func @transform_11(%arg0: i32) -> (i32, i32) {
    %c0_i32 = arith.constant 0 : i32
    %c0_i32_0 = arith.constant 0 : i32
    %c0_i32_1 = arith.constant 0 : i32
    return %c0_i32, %c0_i32_0 : i32, i32
  }
  func.func @transform_12(%arg0: i32) -> (i32, i32) {
    %c0_i32 = arith.constant 0 : i32
    %c0_i32_0 = arith.constant 0 : i32
    %c0_i32_1 = arith.constant 0 : i32
    return %c0_i32, %c0_i32_0 : i32, i32
  }
  func.func @transform_13(%arg0: i32) -> (i32, i32) {
    %c0_i32 = arith.constant 0 : i32
    %c0_i32_0 = arith.constant 0 : i32
    return %arg0, %c0_i32 : i32, i32
  }
}

module attributes {stable_mosaic.version = 11 : i64} {
  func.func @_fused_cnn_kernel(%arg0: i32, %arg1: memref<2x64xf32, #tpu.memory_space<vmem>>, %arg2: memref<64x512xbf16, #tpu.memory_space<vmem>>, %arg3: memref<3x512xf32, #tpu.memory_space<vmem>>, %arg4: memref<512x256xbf16, #tpu.memory_space<vmem>>, %arg5: memref<3x256xf32, #tpu.memory_space<vmem>>, %arg6: memref<256x128xbf16, #tpu.memory_space<vmem>>, %arg7: memref<3x128xf32, #tpu.memory_space<vmem>>, %arg8: memref<128x128xbf16, #tpu.memory_space<vmem>>, %arg9: memref<1x128xf32, #tpu.memory_space<vmem>>, %arg10: memref<128x128xbf16, #tpu.memory_space<vmem>>, %arg11: memref<1x128xf32, #tpu.memory_space<vmem>>, %arg12: memref<128x128xbf16, #tpu.memory_space<vmem>>, %arg13: memref<1x128xf32, #tpu.memory_space<vmem>>, %arg14: memref<2x128xf32, #tpu.memory_space<vmem>>) attributes {dimension_semantics = [#tpu.dimension_semantics<parallel>], iteration_bounds = array<i64: 1>, scalar_prefetch = 0 : i64, scratch_operands = 0 : i64, tpu.core_type = #tpu.core_type<tc>, window_params = [{transform_indices = @transform_0, window_bounds = array<i64: 2, 64>}, {pipeline_mode = #tpu.pipeline_mode<synchronous>, transform_indices = @transform_1, window_bounds = array<i64: 64, 512>}, {pipeline_mode = #tpu.pipeline_mode<synchronous>, transform_indices = @transform_2, window_bounds = array<i64: 3, 512>}, {pipeline_mode = #tpu.pipeline_mode<synchronous>, transform_indices = @transform_3, window_bounds = array<i64: 512, 256>}, {pipeline_mode = #tpu.pipeline_mode<synchronous>, transform_indices = @transform_4, window_bounds = array<i64: 3, 256>}, {pipeline_mode = #tpu.pipeline_mode<synchronous>, transform_indices = @transform_5, window_bounds = array<i64: 256, 128>}, {pipeline_mode = #tpu.pipeline_mode<synchronous>, transform_indices = @transform_6, window_bounds = array<i64: 3, 128>}, {pipeline_mode = #tpu.pipeline_mode<synchronous>, transform_indices = @transform_7, window_bounds = array<i64: 128, 128>}, {pipeline_mode = #tpu.pipeline_mode<synchronous>, transform_indices = @transform_8, window_bounds = array<i64: 1, 128>}, {pipeline_mode = #tpu.pipeline_mode<synchronous>, transform_indices = @transform_9, window_bounds = array<i64: 128, 128>}, {pipeline_mode = #tpu.pipeline_mode<synchronous>, transform_indices = @transform_10, window_bounds = array<i64: 1, 128>}, {pipeline_mode = #tpu.pipeline_mode<synchronous>, transform_indices = @transform_11, window_bounds = array<i64: 128, 128>}, {pipeline_mode = #tpu.pipeline_mode<synchronous>, transform_indices = @transform_12, window_bounds = array<i64: 1, 128>}, {transform_indices = @transform_13, window_bounds = array<i64: 2, 128>}]} {
    %c0 = arith.constant 0 : index
    %c0_0 = arith.constant 0 : index
    %0 = vector.load %arg1[%c0, %c0_0] : memref<2x64xf32, #tpu.memory_space<vmem>>, vector<2x64xf32>
    %c0_1 = arith.constant 0 : index
    %c0_2 = arith.constant 0 : index
    %1 = vector.load %arg3[%c0_1, %c0_2] : memref<3x512xf32, #tpu.memory_space<vmem>>, vector<3x512xf32>
    %2 = arith.truncf %0 : vector<2x64xf32> to vector<2x64xbf16>
    %c0_3 = arith.constant 0 : index
    %c0_4 = arith.constant 0 : index
    %3 = vector.load %arg2[%c0_3, %c0_4] : memref<64x512xbf16, #tpu.memory_space<vmem>>, vector<64x512xbf16>
    %cst = arith.constant dense<0.000000e+00> : vector<2x512xf32>
    %4 = tpu.matmul %2, %3, %cst {dimension_numbers = #tpu.dot_dimension_numbers<[1], [0], [0], [1], [0, 0, 1, 1], [], []>} : vector<2x64xbf16>, vector<64x512xbf16>, vector<2x512xf32> -> vector<2x512xf32>
    %5 = vector.extract_strided_slice %1 {offsets = [0, 0], sizes = [1, 512], strides = [1, 1]} : vector<3x512xf32> to vector<1x512xf32>
    %6 = vector.broadcast %5 : vector<1x512xf32> to vector<2x512xf32>
    %7 = arith.addf %4, %6 : vector<2x512xf32>
    %cst_5 = arith.constant 0.000000e+00 : f32
    %8 = vector.broadcast %cst_5 : f32 to vector<2x512xf32>
    %9 = arith.maximumf %7, %8 : vector<2x512xf32>
    %10 = vector.extract_strided_slice %1 {offsets = [1, 0], sizes = [1, 512], strides = [1, 1]} : vector<3x512xf32> to vector<1x512xf32>
    %11 = vector.broadcast %10 : vector<1x512xf32> to vector<2x512xf32>
    %12 = arith.mulf %9, %11 : vector<2x512xf32>
    %13 = vector.extract_strided_slice %1 {offsets = [2, 0], sizes = [1, 512], strides = [1, 1]} : vector<3x512xf32> to vector<1x512xf32>
    %14 = vector.broadcast %13 : vector<1x512xf32> to vector<2x512xf32>
    %15 = arith.addf %12, %14 : vector<2x512xf32>
    %c0_6 = arith.constant 0 : index
    %c0_7 = arith.constant 0 : index
    %16 = vector.load %arg5[%c0_6, %c0_7] : memref<3x256xf32, #tpu.memory_space<vmem>>, vector<3x256xf32>
    %17 = arith.truncf %15 : vector<2x512xf32> to vector<2x512xbf16>
    %c0_8 = arith.constant 0 : index
    %c0_9 = arith.constant 0 : index
    %18 = vector.load %arg4[%c0_8, %c0_9] : memref<512x256xbf16, #tpu.memory_space<vmem>>, vector<512x256xbf16>
    %cst_10 = arith.constant dense<0.000000e+00> : vector<2x256xf32>
    %19 = tpu.matmul %17, %18, %cst_10 {dimension_numbers = #tpu.dot_dimension_numbers<[1], [0], [0], [1], [0, 0, 1, 1], [], []>} : vector<2x512xbf16>, vector<512x256xbf16>, vector<2x256xf32> -> vector<2x256xf32>
    %20 = vector.extract_strided_slice %16 {offsets = [0, 0], sizes = [1, 256], strides = [1, 1]} : vector<3x256xf32> to vector<1x256xf32>
    %21 = vector.broadcast %20 : vector<1x256xf32> to vector<2x256xf32>
    %22 = arith.addf %19, %21 : vector<2x256xf32>
    %cst_11 = arith.constant 0.000000e+00 : f32
    %23 = vector.broadcast %cst_11 : f32 to vector<2x256xf32>
    %24 = arith.maximumf %22, %23 : vector<2x256xf32>
    %25 = vector.extract_strided_slice %16 {offsets = [1, 0], sizes = [1, 256], strides = [1, 1]} : vector<3x256xf32> to vector<1x256xf32>
    %26 = vector.broadcast %25 : vector<1x256xf32> to vector<2x256xf32>
    %27 = arith.mulf %24, %26 : vector<2x256xf32>
    %28 = vector.extract_strided_slice %16 {offsets = [2, 0], sizes = [1, 256], strides = [1, 1]} : vector<3x256xf32> to vector<1x256xf32>
    %29 = vector.broadcast %28 : vector<1x256xf32> to vector<2x256xf32>
    %30 = arith.addf %27, %29 : vector<2x256xf32>
    %c0_12 = arith.constant 0 : index
    %c0_13 = arith.constant 0 : index
    %31 = vector.load %arg7[%c0_12, %c0_13] : memref<3x128xf32, #tpu.memory_space<vmem>>, vector<3x128xf32>
    %32 = arith.truncf %30 : vector<2x256xf32> to vector<2x256xbf16>
    %c0_14 = arith.constant 0 : index
    %c0_15 = arith.constant 0 : index
    %33 = vector.load %arg6[%c0_14, %c0_15] : memref<256x128xbf16, #tpu.memory_space<vmem>>, vector<256x128xbf16>
    %cst_16 = arith.constant dense<0.000000e+00> : vector<2x128xf32>
    %34 = tpu.matmul %32, %33, %cst_16 {dimension_numbers = #tpu.dot_dimension_numbers<[1], [0], [0], [1], [0, 0, 1, 1], [], []>} : vector<2x256xbf16>, vector<256x128xbf16>, vector<2x128xf32> -> vector<2x128xf32>
    %35 = vector.extract_strided_slice %31 {offsets = [0, 0], sizes = [1, 128], strides = [1, 1]} : vector<3x128xf32> to vector<1x128xf32>
    %36 = vector.broadcast %35 : vector<1x128xf32> to vector<2x128xf32>
    %37 = arith.addf %34, %36 : vector<2x128xf32>
    %cst_17 = arith.constant 0.000000e+00 : f32
    %38 = vector.broadcast %cst_17 : f32 to vector<2x128xf32>
    %39 = arith.maximumf %37, %38 : vector<2x128xf32>
    %40 = vector.extract_strided_slice %31 {offsets = [1, 0], sizes = [1, 128], strides = [1, 1]} : vector<3x128xf32> to vector<1x128xf32>
    %41 = vector.broadcast %40 : vector<1x128xf32> to vector<2x128xf32>
    %42 = arith.mulf %39, %41 : vector<2x128xf32>
    %43 = vector.extract_strided_slice %31 {offsets = [2, 0], sizes = [1, 128], strides = [1, 1]} : vector<3x128xf32> to vector<1x128xf32>
    %44 = vector.broadcast %43 : vector<1x128xf32> to vector<2x128xf32>
    %45 = arith.addf %42, %44 : vector<2x128xf32>
    %46 = arith.truncf %45 : vector<2x128xf32> to vector<2x128xbf16>
    %c0_18 = arith.constant 0 : index
    %c0_19 = arith.constant 0 : index
    %47 = vector.load %arg8[%c0_18, %c0_19] : memref<128x128xbf16, #tpu.memory_space<vmem>>, vector<128x128xbf16>
    %cst_20 = arith.constant dense<0.000000e+00> : vector<2x128xf32>
    %48 = tpu.matmul %46, %47, %cst_20 {dimension_numbers = #tpu.dot_dimension_numbers<[1], [0], [0], [1], [0, 0, 1, 1], [], []>} : vector<2x128xbf16>, vector<128x128xbf16>, vector<2x128xf32> -> vector<2x128xf32>
    %c0_21 = arith.constant 0 : index
    %c0_22 = arith.constant 0 : index
    %49 = vector.load %arg9[%c0_21, %c0_22] : memref<1x128xf32, #tpu.memory_space<vmem>>, vector<1x128xf32>
    %50 = vector.broadcast %49 : vector<1x128xf32> to vector<2x128xf32>
    %51 = arith.addf %48, %50 : vector<2x128xf32>
    %cst_23 = arith.constant 0.000000e+00 : f32
    %52 = vector.broadcast %cst_23 : f32 to vector<2x128xf32>
    %53 = arith.maximumf %51, %52 : vector<2x128xf32>
    %54 = arith.truncf %53 : vector<2x128xf32> to vector<2x128xbf16>
    %c0_24 = arith.constant 0 : index
    %c0_25 = arith.constant 0 : index
    %55 = vector.load %arg10[%c0_24, %c0_25] : memref<128x128xbf16, #tpu.memory_space<vmem>>, vector<128x128xbf16>
    %cst_26 = arith.constant dense<0.000000e+00> : vector<2x128xf32>
    %56 = tpu.matmul %54, %55, %cst_26 {dimension_numbers = #tpu.dot_dimension_numbers<[1], [0], [0], [1], [0, 0, 1, 1], [], []>} : vector<2x128xbf16>, vector<128x128xbf16>, vector<2x128xf32> -> vector<2x128xf32>
    %c0_27 = arith.constant 0 : index
    %c0_28 = arith.constant 0 : index
    %57 = vector.load %arg11[%c0_27, %c0_28] : memref<1x128xf32, #tpu.memory_space<vmem>>, vector<1x128xf32>
    %58 = vector.broadcast %57 : vector<1x128xf32> to vector<2x128xf32>
    %59 = arith.addf %56, %58 : vector<2x128xf32>
    %cst_29 = arith.constant 0.000000e+00 : f32
    %60 = vector.broadcast %cst_29 : f32 to vector<2x128xf32>
    %61 = arith.maximumf %59, %60 : vector<2x128xf32>
    %62 = arith.truncf %61 : vector<2x128xf32> to vector<2x128xbf16>
    %c0_30 = arith.constant 0 : index
    %c0_31 = arith.constant 0 : index
    %63 = vector.load %arg12[%c0_30, %c0_31] : memref<128x128xbf16, #tpu.memory_space<vmem>>, vector<128x128xbf16>
    %cst_32 = arith.constant dense<0.000000e+00> : vector<2x128xf32>
    %64 = tpu.matmul %62, %63, %cst_32 {dimension_numbers = #tpu.dot_dimension_numbers<[1], [0], [0], [1], [0, 0, 1, 1], [], []>} : vector<2x128xbf16>, vector<128x128xbf16>, vector<2x128xf32> -> vector<2x128xf32>
    %c0_33 = arith.constant 0 : index
    %c0_34 = arith.constant 0 : index
    %65 = vector.load %arg13[%c0_33, %c0_34] : memref<1x128xf32, #tpu.memory_space<vmem>>, vector<1x128xf32>
    %66 = vector.broadcast %65 : vector<1x128xf32> to vector<2x128xf32>
    %67 = arith.addf %64, %66 : vector<2x128xf32>
    %c0_35 = arith.constant 0 : index
    %c0_36 = arith.constant 0 : index
    %68 = vector.load %arg14[%c0_35, %c0_36] : memref<2x128xf32, #tpu.memory_space<vmem>>, vector<2x128xf32>
    tpu.vector_store %arg14[%c0_35, %c0_36], %67 {strides = array<i32>} : memref<2x128xf32, #tpu.memory_space<vmem>>, vector<2x128xf32>,
    return
  }
  func.func @transform_0(%arg0: i32) -> (i32, i32) {
    %c0_i32 = arith.constant 0 : i32
    %c0_i32_0 = arith.constant 0 : i32
    return %arg0, %c0_i32 : i32, i32
  }
  func.func @transform_1(%arg0: i32) -> (i32, i32) {
    %c0_i32 = arith.constant 0 : i32
    %c0_i32_0 = arith.constant 0 : i32
    %c0_i32_1 = arith.constant 0 : i32
    return %c0_i32, %c0_i32_0 : i32, i32
  }
  func.func @transform_2(%arg0: i32) -> (i32, i32) {
    %c0_i32 = arith.constant 0 : i32
    %c0_i32_0 = arith.constant 0 : i32
    %c0_i32_1 = arith.constant 0 : i32
    return %c0_i32, %c0_i32_0 : i32, i32
  }
  func.func @transform_3(%arg0: i32) -> (i32, i32) {
    %c0_i32 = arith.constant 0 : i32
    %c0_i32_0 = arith.constant 0 : i32
    %c0_i32_1 = arith.constant 0 : i32
    return %c0_i32, %c0_i32_0 : i32, i32
  }
  func.func @transform_4(%arg0: i32) -> (i32, i32) {
    %c0_i32 = arith.constant 0 : i32
    %c0_i32_0 = arith.constant 0 : i32
    %c0_i32_1 = arith.constant 0 : i32
    return %c0_i32, %c0_i32_0 : i32, i32
  }
  func.func @transform_5(%arg0: i32) -> (i32, i32) {
    %c0_i32 = arith.constant 0 : i32
    %c0_i32_0 = arith.constant 0 : i32
    %c0_i32_1 = arith.constant 0 : i32
    return %c0_i32, %c0_i32_0 : i32, i32
  }
  func.func @transform_6(%arg0: i32) -> (i32, i32) {
    %c0_i32 = arith.constant 0 : i32
    %c0_i32_0 = arith.constant 0 : i32
    %c0_i32_1 = arith.constant 0 : i32
    return %c0_i32, %c0_i32_0 : i32, i32
  }
  func.func @transform_7(%arg0: i32) -> (i32, i32) {
    %c0_i32 = arith.constant 0 : i32
    %c0_i32_0 = arith.constant 0 : i32
    %c0_i32_1 = arith.constant 0 : i32
    return %c0_i32, %c0_i32_0 : i32, i32
  }
  func.func @transform_8(%arg0: i32) -> (i32, i32) {
    %c0_i32 = arith.constant 0 : i32
    %c0_i32_0 = arith.constant 0 : i32
    %c0_i32_1 = arith.constant 0 : i32
    return %c0_i32, %c0_i32_0 : i32, i32
  }
  func.func @transform_9(%arg0: i32) -> (i32, i32) {
    %c0_i32 = arith.constant 0 : i32
    %c0_i32_0 = arith.constant 0 : i32
    %c0_i32_1 = arith.constant 0 : i32
    return %c0_i32, %c0_i32_0 : i32, i32
  }
  func.func @transform_10(%arg0: i32) -> (i32, i32) {
    %c0_i32 = arith.constant 0 : i32
    %c0_i32_0 = arith.constant 0 : i32
    %c0_i32_1 = arith.constant 0 : i32
    return %c0_i32, %c0_i32_0 : i32, i32
  }
  func.func @transform_11(%arg0: i32) -> (i32, i32) {
    %c0_i32 = arith.constant 0 : i32
    %c0_i32_0 = arith.constant 0 : i32
    %c0_i32_1 = arith.constant 0 : i32
    return %c0_i32, %c0_i32_0 : i32, i32
  }
  func.func @transform_12(%arg0: i32) -> (i32, i32) {
    %c0_i32 = arith.constant 0 : i32
    %c0_i32_0 = arith.constant 0 : i32
    %c0_i32_1 = arith.constant 0 : i32
    return %c0_i32, %c0_i32_0 : i32, i32
  }
  func.func @transform_13(%arg0: i32) -> (i32, i32) {
    %c0_i32 = arith.constant 0 : i32
    %c0_i32_0 = arith.constant 0 : i32
    return %arg0, %c0_i32 : i32, i32
  }
}

</mosaic_0001>

<bundles_post_ra>
// kernel: cnn_forward.1
= control target key start
LH: loop header
LB: loop body
LE: loop exit
PB: predicated region body
PF: predicated region fallthrough
CT: control target
= control target key end

     0   :  { %18 = vsyncpa [#allocation3], 0  ;;  %s2288_s0 = inlined_call_operand.vmem [shape: f32[2,64], index: 0, kind: input, shape index: {}]   ;;  %s2289_s1 = inlined_call_operand.hbm [shape: bf16[64,512], index: 1, kind: input, shape index: {}]   ;;  %s2290_s2 = inlined_call_operand.hbm [shape: f32[3,512], index: 2, kind: input, shape index: {}]   ;;  %s2291_s3 = inlined_call_operand.hbm [shape: bf16[512,256], index: 3, kind: input, shape index: {}]   ;;  %s2292_s4 = inlined_call_operand.vmem [shape: f32[3,256], index: 4, kind: input, shape index: {}]   ;;  %s2293_s5 = inlined_call_operand.hbm [shape: bf16[256,128], index: 5, kind: input, shape index: {}]   ;;  %s2294_s6 = inlined_call_operand.vmem [shape: f32[3,128], index: 6, kind: input, shape index: {}]   ;;  %s2295_s7 = inlined_call_operand.hbm [shape: bf16[128,128], index: 7, kind: input, shape index: {}]   ;;  %s2296_s8 = inlined_call_operand.vmem [shape: f32[1,128], index: 8, kind: input, shape index: {}]   ;;  %s2297_s9 = inlined_call_operand.hbm [shape: bf16[128,128], index: 9, kind: input, shape index: {}]   ;;  %s2298_s10 = inlined_call_operand.vmem [shape: f32[1,128], index: 10, kind: input, shape index: {}]   ;;  %s2299_s11 = inlined_call_operand.hbm [shape: bf16[128,128], index: 11, kind: input, shape index: {}]   ;;  %s2300_s12 = inlined_call_operand.vmem [shape: f32[1,128], index: 12, kind: input, shape index: {}]   ;;  %s2301_s13 = inlined_call_operand.hbm [shape: f32[2,128], index: 13, kind: output, shape index: {}]  }
   0x1   :  { %19 = vsyncpa [#allocation6], 0 }
   0x2   :  { %20 = vsyncpa [#allocation9], 0 }
   0x3   :  { %21 = vsyncpa [#allocation12], 0  ;;  %s43_s27 = sshll.u32 %s2290_s2, 4  ;;  %s44_s27 = int_to_ptr.hbm [resolvable:$true] %s43_s27 }
   0x4   :  { %22 = vsyncpa [#allocation4], 0  ;;  %s2132_s28 = smov [#allocation5]   ;;  %s68_s15 = sshll.u32 %s2293_s5, 4  ;;  %s69_s15 = int_to_ptr.hbm [resolvable:$true] %s68_s15 }
   0x5   :  { %s45_s29 = sshll.u32 %s2132_s28, 4  ;;  %s2133_s16 = smov [#allocation8]   ;;  %s46_s29 = int_to_ptr.vmem [resolvable:$true] %s45_s29 }
   0x6   :  { %48 = dma.hbm_to_vmem [thread:$0]  %s44_s27, 256, %s46_s29, [#allocation6]  }
   0x7   :  { %s70_s17 = sshll.u32 %s2133_s16, 4  ;;  %s2134_s18 = smov 64   ;;  %s71_s17 = int_to_ptr.vmem [resolvable:$true] %s70_s17 }
   0x8   :  { %s2135_s19 = smov 4   ;;  %s98_s21 = sshll.u32 %s2297_s9, 4  ;;  %s99_s21 = int_to_ptr.hbm [resolvable:$true] %s98_s21 }
   0x9   :  { %76 = dma.hbm_to_vmem [thread:$0]  %s69_s15, 2048, %s71_s17, [#allocation9], %s2134_s18, %s2134_s18, %s2135_s19  }
   0xa   :  { %s2136_s22 = smov [#allocation11]   ;;  %s29_s25 = sshll.u32 %s2289_s1, 4  ;;  %s30_s25 = int_to_ptr.hbm [resolvable:$true] %s29_s25 }
   0xb   :  { %s100_s23 = sshll.u32 %s2136_s22, 4  ;;  %s2137_s26 = smov [#allocation2]   ;;  %s101_s23 = int_to_ptr.vmem [resolvable:$true] %s100_s23 }
   0xc   :  { %106 = dma.hbm_to_vmem [thread:$0]  %s99_s21, 1024, %s101_s23, [#allocation12], %s2134_s18, %s2134_s18, %s2135_s19  }
   0xd   :  { %s31_s27 = sshll.u32 %s2137_s26, 4  ;;  %s2138_s28 = smov 256   ;;  %s32_s27 = int_to_ptr.vmem [resolvable:$true] %s31_s27 }
   0xe   :  { %s2139_s29 = smov 16   ;;  %s53_s14 = sshll.u32 %s2291_s3, 4  ;;  %s54_s14 = int_to_ptr.hbm [resolvable:$true] %s53_s14 }
   0xf   :  { %37 = dma.hbm_to_vmem [thread:$0]  %s30_s25, 2048, %s32_s27, [#allocation3], %s2138_s28, %s2138_s28, %s2139_s29  }
  0x10   :  { %s2140_s15 = smov [#allocation7]   ;;  %s83_s2 = sshll.u32 %s2295_s7, 4  ;;  %s84_s2 = int_to_ptr.hbm [resolvable:$true] %s83_s2 }
  0x11   :  { %s55_s16 = sshll.u32 %s2140_s15, 4  ;;  %s2141_s20 = smov 128   ;;  %s56_s16 = int_to_ptr.vmem [resolvable:$true] %s55_s16 }
  0x12   :  { %s2142_s21 = smov 8   ;;  %s2143_s22 = smov [#allocation10]  }
  0x13   :  { %61 = dma.hbm_to_vmem [thread:$0]  %s54_s14, 8192, %s56_s16, [#allocation6], %s2141_s20, %s2141_s20, %s2142_s21  }
  0x14   :  { %s85_s23 = sshll.u32 %s2143_s22, 4  ;;  %s113_s25 = sshll.u32 %s2299_s11, 4  ;;  %s86_s23 = int_to_ptr.vmem [resolvable:$true] %s85_s23  ;;  %s114_s25 = int_to_ptr.hbm [resolvable:$true] %s113_s25 }
  0x15   :  { %91 = dma.hbm_to_vmem [thread:$0]  %s84_s2, 1024, %s86_s23, [#allocation9], %s2134_s18, %s2134_s18, %s2135_s19  }
  0x16   :  { %s2144_s3 = smov [#allocation13]  }
  0x17   :  { %s115_s26 = sshll.u32 %s2144_s3, 4  ;;  %s116_s26 = int_to_ptr.vmem [resolvable:$true] %s115_s26 }
  0x18   :  { %121 = dma.hbm_to_vmem [thread:$0]  %s114_s25, 1024, %s116_s26, [#allocation12], %s2134_s18, %s2134_s18, %s2135_s19  }
  0x19   :  { %2122 = dma.done.wait [#allocation3], 2048  }
  0x1a   :  { %2123 = vsyncadd [#allocation3], 4294965248 }
  0x1b   :  { %2124 = dma.done.wait [#allocation6], 8448  }
  0x1c   :  { %2125 = vsyncadd [#allocation6], 4294958848 }
  0x1d   :  { %2126 = dma.done.wait [#allocation9], 3072  }
  0x1e   :  { %2127 = vsyncadd [#allocation9], 4294964224 }
  0x1f   :  { %2128 = dma.done.wait [#allocation12], 2048  }
  0x20   :  { %2129 = vsyncadd [#allocation12], 4294965248  ;;  %v1359_v0 = vld [vmem:[#allocation2 + $0x60] sm:$0xf]  ;;  %v1807_v1 = vld [vmem:[#allocation2 + $0x6c] sm:$0xf0] }
  0x21   :  { %v1367_v2 = vld [vmem:[#allocation2 + $0x68] sm:$0xf]  ;;  %v1360_v3 = vor.u32 %v1807_v1, %v1359_v0  ;;  %v1808_v4 = vld [vmem:[#allocation2 + $0x74] sm:$0xf0]  ;;  %v1806_v5 = vld [vmem:[#allocation2 + $0x6c] sm:$0xf] }
  0x22   :  { %v1369_v6 = vld [vmem:[#allocation2 + $0x78] sm:$0xf0]  ;;  %v1368_v7 = vor.u32 %v1808_v4, %v1367_v2  ;;  %v1343_v9 = vld [vmem:[#allocation2 + $0x40] sm:$0xf]  ;;  %v1803_v10 = vld [vmem:[#allocation2 + $0x4c] sm:$0xf0] }
  0x23   :  { %v1372_v8 = vor.u32 %v1806_v5, %v1369_v6  ;;  %v1351_v11 = vld [vmem:[#allocation2 + $0x48] sm:$0xf]  ;;  %275 = vmatpush.bf16.msra.mxu1 %v1360_v3  ;;  %v1344_v12 = vor.u32 %v1803_v10, %v1343_v9  ;;  %v1804_v13 = vld [vmem:[#allocation2 + $0x54] sm:$0xf0]  ;;  %v1802_v14 = vld [vmem:[#allocation2 + $0x4c] sm:$0xf] }
  0x24   :  { %v1353_v15 = vld [vmem:[#allocation2 + $0x58] sm:$0xf0]  ;;  %301 = vmatpush.bf16.msra.mxu2 %v1368_v7  ;;  %v1352_v16 = vor.u32 %v1804_v13, %v1351_v11  ;;  %v1327_v18 = vld [vmem:[#allocation2 + $0x20] sm:$0xf]  ;;  %v1799_v19 = vld [vmem:[#allocation2 + $0x2c] sm:$0xf0] }
  0x25   :  { %314 = vmatpush.bf16.msra.mxu3 %v1372_v8  ;;  %v1356_v17 = vor.u32 %v1802_v14, %v1353_v15  ;;  %v1335_v20 = vld [vmem:[#allocation2 + $0x28] sm:$0xf]  ;;  %v1800_v21 = vld [vmem:[#allocation2 + $0x34] sm:$0xf0]  ;;  %v1798_v22 = vld [vmem:[#allocation2 + $0x2c] sm:$0xf]  ;;  %v1328_v24 = vor.u32 %v1799_v19, %v1327_v18 }
  0x26   :  { %v1337_v23 = vld [vmem:[#allocation2 + $0x38] sm:$0xf0]  ;;  %v1336_v25 = vor.u32 %v1800_v21, %v1335_v20  ;;  %v1311_v27 = vld [vmem:[#allocation2] sm:$0xf]  ;;  %v1795_v28 = vld [vmem:[#allocation2 + $0xc] sm:$0xf0] }
  0x27   :  { %276 = vmatpush.bf16.msra.mxu1 %v1344_v12  ;;  %v1340_v26 = vor.u32 %v1798_v22, %v1337_v23  ;;  %v1319_v29 = vld [vmem:[#allocation2 + $0x8] sm:$0xf]  ;;  %v1796_v30 = vld [vmem:[#allocation2 + $0x14] sm:$0xf0]  ;;  %v1794_v31 = vld [vmem:[#allocation2 + $0xc] sm:$0xf]  ;;  %v1312_v36 = vor.u32 %v1795_v28, %v1311_v27 }
  0x28   :  { %302 = vmatpush.bf16.msra.mxu2 %v1352_v16  ;;  %v1321_v32 = vld [vmem:[#allocation2 + $0x18] sm:$0xf0]  ;;  %v153_v33 = vld [vmem:[%s2288_s0] sm:$0x3]  ;;  %v1805_v34 = vld [vmem:[#allocation2 + $0x64] sm:$0xf]  ;;  %v1320_v40 = vor.u32 %v1796_v30, %v1319_v29 }
  0x29   :  { %315 = vmatpush.bf16.msra.mxu3 %v1356_v17  ;;  %v1361_v35 = vld [vmem:[#allocation2 + $0x70] sm:$0xf0]  ;;  %v1435_v37 = vld [vmem:[#allocation7 + $0x70] sm:$0xf]  ;;  %v1824_v38 = vld [vmem:[#allocation7 + $0x74] sm:$0xf0]  ;;  %v1324_v41 = vor.u32 %v1794_v31, %v1321_v32  ;;  %v2252_v51 = vpack.c.bf16 %v153_v33, %v153_v33 }
  0x2a   :  { %v1427_v39 = vld [vmem:[#allocation7 + $0x60] sm:$0xf]  ;;  %v1436_v42 = vor.u32 %v1824_v38, %v1435_v37  ;;  %v1822_v43 = vld [vmem:[#allocation7 + $0x64] sm:$0xf0]  ;;  %v1563_v44 = vld [vmem:[#allocation7 + $0x170] sm:$0xf]  ;;  %v1364_v46 = vor.u32 %v1805_v34, %v1361_v35 }
  0x2b   :  { %277 = vmatpush.bf16.msra.mxu1 %v1328_v24  ;;  %v1856_v45 = vld [vmem:[#allocation7 + $0x174] sm:$0xf0]  ;;  %v1801_v47 = vld [vmem:[#allocation2 + $0x44] sm:$0xf]  ;;  %v1627_v49 = vld [vmem:[#allocation7 + $0x1f0] sm:$0xf]  ;;  %v1428_v53 = vor.u32 %v1822_v43, %v1427_v39 }
  0x2c   :  { %303 = vmatpush.bf16.msra.mxu2 %v1336_v25  ;;  %v1564_v48 = vor.u32 %v1856_v45, %v1563_v44  ;;  %v1872_v50 = vld [vmem:[#allocation7 + $0x1f4] sm:$0xf0]  ;;  %v1345_v52 = vld [vmem:[#allocation2 + $0x50] sm:$0xf0]  ;;  %755 = vmatpush.bf16.msra.mxu0 %v1436_v42  ;;  %v1555_v54 = vld [vmem:[#allocation7 + $0x160] sm:$0xf] }
  0x2d   :  { %316 = vmatpush.bf16.msra.mxu3 %v1340_v26  ;;  %v1854_v55 = vld [vmem:[#allocation7 + $0x164] sm:$0xf0]  ;;  %vm267_vm0 = vcmask 523264   ;;  %v1419_v56 = vld [vmem:[#allocation7 + $0x50] sm:$0xf]  ;;  %v1628_v58 = vor.u32 %v1872_v50, %v1627_v49  ;;  %v1348_v59 = vor.u32 %v1801_v47, %v1345_v52  ;;  %s2145_s30 = smov [#allocation14]  }
  0x2e   :  { %v1820_v57 = vld [vmem:[#allocation7 + $0x54] sm:$0xf0]  ;;  %v1797_v60 = vld [vmem:[#allocation2 + $0x24] sm:$0xf]  ;;  %v1556_v61 = vor.u32 %v1854_v55, %v1555_v54  ;;  %v1619_v62 = vld [vmem:[#allocation7 + $0x1e0] sm:$0xf] }
  0x2f   :  { %278 = vmatpush.bf16.msra.mxu1 %v1312_v36  ;;  %v1870_v63 = vld [vmem:[#allocation7 + $0x1e4] sm:$0xf0]  ;;  %v1329_v0 = vld [vmem:[#allocation2 + $0x30] sm:$0xf0]  ;;  %v1420_v1 = vor.u32 %v1820_v57, %v1419_v56  ;;  %v1547_v2 = vld [vmem:[#allocation7 + $0x150] sm:$0xf] }
  0x30   :  { %304 = vmatpush.bf16.msra.mxu2 %v1320_v40  ;;  %756 = vmatpush.bf16.msra.mxu0 %v1428_v53  ;;  %v1852_v3 = vld [vmem:[#allocation7 + $0x154] sm:$0xf0]  ;;  %v1411_v4 = vld [vmem:[#allocation7 + $0x40] sm:$0xf]  ;;  %v1818_v5 = vld [vmem:[#allocation7 + $0x44] sm:$0xf0]  ;;  %v1620_v7 = vor.u32 %v1870_v63, %v1619_v62  ;;  %v1332_v8 = vor.u32 %v1797_v60, %v1329_v0 }
  0x31   :  { %317 = vmatpush.bf16.msra.mxu3 %v1324_v41  ;;  %v1793_v6 = vld [vmem:[#allocation2 + $0x4] sm:$0xf]  ;;  %v1313_v9 = vld [vmem:[#allocation2 + $0x10] sm:$0xf0]  ;;  %v1548_v10 = vor.u32 %v1852_v3, %v1547_v2  ;;  %v1611_v11 = vld [vmem:[#allocation7 + $0x1d0] sm:$0xf]  ;;  %v1412_v13 = vor.u32 %v1818_v5, %v1411_v4 }
  0x32   :  { %1373 = vmatmul.msk.bf16.vlgmr.msra.gmra.mxu1 %vm267_vm0, %v2252_v51  ;;  %v1868_v12 = vld [vmem:[#allocation7 + $0x1d4] sm:$0xf0]  ;;  %v1403_v14 = vld [vmem:[#allocation7 + $0x30] sm:$0xf]  ;;  %v1539_v15 = vld [vmem:[#allocation7 + $0x140] sm:$0xf]  ;;  %v1316_v21 = vor.u32 %v1793_v6, %v1313_v9 }
  0x33   :  { %288 = vmatpush.bf16.msrb.mxu1 %v1364_v46  ;;  %1375 = vmatmul.msk.bf16.vlgmr.msra.gmra.mxu2 %vm267_vm0, %v2252_v51  ;;  %v1850_v16 = vld [vmem:[#allocation7 + $0x144] sm:$0xf0]  ;;  %v1816_v17 = vld [vmem:[#allocation7 + $0x34] sm:$0xf0]  ;;  %v1499_v18 = vld [vmem:[#allocation7 + $0xf0] sm:$0xf]  ;;  %v1612_v20 = vor.u32 %v1868_v12, %v1611_v11 }
  0x34   :  { %781 = vmatpush.bf16.msrb.mxu2 %v1564_v48  ;;  %1376 = vmatmul.msk.bf16.vlgmr.msra.gmra.mxu3 %vm267_vm0, %v2252_v51  ;;  %v1840_v19 = vld [vmem:[#allocation7 + $0xf4] sm:$0xf0]  ;;  %v1540_v22 = vor.u32 %v1850_v16, %v1539_v15  ;;  %v1603_v23 = vld [vmem:[#allocation7 + $0x1c0] sm:$0xf]  ;;  %v1866_v24 = vld [vmem:[#allocation7 + $0x1c4] sm:$0xf0]  ;;  %v1404_v25 = vor.u32 %v1816_v17, %v1403_v14 }
  0x35   :  { %794 = vmatpush.bf16.msrb.mxu3 %v1628_v58  ;;  %757 = vmatpush.bf16.msra.mxu0 %v1420_v1  ;;  %v1500_v26 = vor.u32 %v1840_v19, %v1499_v18  ;;  %v1531_v27 = vld [vmem:[#allocation7 + $0x130] sm:$0xf]  ;;  %v1848_v28 = vld [vmem:[#allocation7 + $0x134] sm:$0xf0]  ;;  %v1395_v29 = vld [vmem:[#allocation7 + $0x20] sm:$0xf]  ;;  %v1604_v31 = vor.u32 %v1866_v24, %v1603_v23 }
  0x36   :  { %v1814_v30 = vld [vmem:[#allocation7 + $0x24] sm:$0xf0]  ;;  %v1491_v32 = vld [vmem:[#allocation7 + $0xe0] sm:$0xf]  ;;  %v1532_v34 = vor.u32 %v1848_v28, %v1531_v27  ;;  %v1595_v35 = vld [vmem:[#allocation7 + $0x1b0] sm:$0xf] }
  0x37   :  { %289 = vmatpush.bf16.msrb.mxu1 %v1348_v59  ;;  %v1838_v33 = vld [vmem:[#allocation7 + $0xe4] sm:$0xf0]  ;;  %v1864_v36 = vld [vmem:[#allocation7 + $0x1b4] sm:$0xf0]  ;;  %v1523_v37 = vld [vmem:[#allocation7 + $0x120] sm:$0xf]  ;;  %v1396_v38 = vor.u32 %v1814_v30, %v1395_v29 }
  0x38   :  { %782 = vmatpush.bf16.msrb.mxu2 %v1556_v61  ;;  %v1846_v39 = vld [vmem:[#allocation7 + $0x124] sm:$0xf0]  ;;  %v1492_v40 = vor.u32 %v1838_v33, %v1491_v32  ;;  %v1387_v41 = vld [vmem:[#allocation7 + $0x10] sm:$0xf]  ;;  %v1812_v42 = vld [vmem:[#allocation7 + $0x14] sm:$0xf0]  ;;  %v1596_v43 = vor.u32 %v1864_v36, %v1595_v35 }
  0x39   :  { %795 = vmatpush.bf16.msrb.mxu3 %v1620_v7  ;;  %758 = vmatpush.bf16.msra.mxu0 %v1412_v13  ;;  %v1483_v44 = vld [vmem:[#allocation7 + $0xd0] sm:$0xf]  ;;  %v1836_v45 = vld [vmem:[#allocation7 + $0xd4] sm:$0xf0]  ;;  %v1524_v46 = vor.u32 %v1846_v39, %v1523_v37  ;;  %v1587_v47 = vld [vmem:[#allocation7 + $0x1a0] sm:$0xf]  ;;  %v1388_v49 = vor.u32 %v1812_v42, %v1387_v41 }
  0x3a   :  { %v1862_v48 = vld [vmem:[#allocation7 + $0x1a4] sm:$0xf0]  ;;  %v1515_v50 = vld [vmem:[#allocation7 + $0x110] sm:$0xf]  ;;  %v1844_v52 = vld [vmem:[#allocation7 + $0x114] sm:$0xf0]  ;;  %v1484_v53 = vor.u32 %v1836_v45, %v1483_v44 }
  0x3b   :  { %290 = vmatpush.bf16.msrb.mxu1 %v1332_v8  ;;  %v1379_v54 = vld [vmem:[#allocation7] sm:$0xf]  ;;  %v1810_v55 = vld [vmem:[#allocation7 + $0x4] sm:$0xf0]  ;;  %v1588_v57 = vor.u32 %v1862_v48, %v1587_v47  ;;  %v1823_v59 = vld [vmem:[#allocation7 + $0x74] sm:$0xf]  ;;  %v1516_v61 = vor.u32 %v1844_v52, %v1515_v50 }
  0x3c   :  { %783 = vmatpush.bf16.msrb.mxu2 %v1548_v10  ;;  %v1475_v56 = vld [vmem:[#allocation7 + $0xc0] sm:$0xf]  ;;  %v1834_v58 = vld [vmem:[#allocation7 + $0xc4] sm:$0xf0]  ;;  %v1437_v60 = vld [vmem:[#allocation7 + $0x78] sm:$0xf0] }
  0x3d   :  { %796 = vmatpush.bf16.msrb.mxu3 %v1612_v20  ;;  %759 = vmatpush.bf16.msra.mxu0 %v1404_v25  ;;  %v1579_v62 = vld [vmem:[#allocation7 + $0x190] sm:$0xf]  ;;  %v1860_v63 = vld [vmem:[#allocation7 + $0x194] sm:$0xf0]  ;;  %v1476_v0 = vor.u32 %v1834_v58, %v1475_v56  ;;  %v1440_v1 = vor.u32 %v1823_v59, %v1437_v60  ;;  %v1821_v6 = vld [vmem:[#allocation7 + $0x64] sm:$0xf] }
  0x3e   :  { %v1580_v2 = vor.u32 %v1860_v63, %v1579_v62  ;;  %v1467_v3 = vld [vmem:[#allocation7 + $0xb0] sm:$0xf]  ;;  %v1832_v4 = vld [vmem:[#allocation7 + $0xb4] sm:$0xf0]  ;;  %v1429_v7 = vld [vmem:[#allocation7 + $0x68] sm:$0xf0] }
  0x3f   :  { %291 = vmatpush.bf16.msrb.mxu1 %v1316_v21  ;;  %v1468_v5 = vor.u32 %v1832_v4, %v1467_v3  ;;  %v1432_v8 = vor.u32 %v1821_v6, %v1429_v7  ;;  %v1507_v9 = vld [vmem:[#allocation7 + $0x100] sm:$0xf]  ;;  %v1842_v10 = vld [vmem:[#allocation7 + $0x104] sm:$0xf0]  ;;  %v1855_v14 = vld [vmem:[#allocation7 + $0x174] sm:$0xf] }
  0x40   :  { %784 = vmatpush.bf16.msrb.mxu2 %v1540_v22  ;;  %v1571_v11 = vld [vmem:[#allocation7 + $0x180] sm:$0xf]  ;;  %v1508_v12 = vor.u32 %v1842_v10, %v1507_v9  ;;  %v1858_v13 = vld [vmem:[#allocation7 + $0x184] sm:$0xf0]  ;;  %v1565_v15 = vld [vmem:[#allocation7 + $0x178] sm:$0xf0] }
  0x41   :  { %797 = vmatpush.bf16.msrb.mxu3 %v1604_v31  ;;  %760 = vmatpush.bf16.msra.mxu0 %v1396_v38  ;;  %v1572_v16 = vor.u32 %v1858_v13, %v1571_v11  ;;  %v1568_v17 = vor.u32 %v1855_v14, %v1565_v15  ;;  %v1871_v18 = vld [vmem:[#allocation7 + $0x1f4] sm:$0xf]  ;;  %v1629_v19 = vld [vmem:[#allocation7 + $0x1f8] sm:$0xf0]  ;;  %v1459_v20 = vld [vmem:[#allocation7 + $0xa0] sm:$0xf] }
  0x42   :  { %1374 = vmatmul.msk.bf16.vlgmr.msrb.gmra.mxu1 %vm267_vm0, %v2252_v51  ;;  %v1380_v51 = vor.u32 %v1810_v55, %v1379_v54  ;;  %v1632_v21 = vor.u32 %v1871_v18, %v1629_v19  ;;  %v1830_v22 = vld [vmem:[#allocation7 + $0xa4] sm:$0xf0]  ;;  %v1819_v23 = vld [vmem:[#allocation7 + $0x54] sm:$0xf]  ;;  %v1421_v25 = vld [vmem:[#allocation7 + $0x58] sm:$0xf0] }
  0x43   :  { %768 = vmatpush.bf16.msra.mxu1 %v1500_v26  ;;  %v1460_v24 = vor.u32 %v1830_v22, %v1459_v20  ;;  %v1424_v26 = vor.u32 %v1819_v23, %v1421_v25  ;;  %v1853_v27 = vld [vmem:[#allocation7 + $0x164] sm:$0xf]  ;;  %v1557_v28 = vld [vmem:[#allocation7 + $0x168] sm:$0xf0]  ;;  %v1451_v33 = vld [vmem:[#allocation7 + $0x90] sm:$0xf] }
  0x44   :  { %785 = vmatpush.bf16.msrb.mxu2 %v1532_v34  ;;  %v1869_v29 = vld [vmem:[#allocation7 + $0x1e4] sm:$0xf]  ;;  %v1621_v30 = vld [vmem:[#allocation7 + $0x1e8] sm:$0xf0]  ;;  %v1560_v31 = vor.u32 %v1853_v27, %v1557_v28  ;;  %v1828_v34 = vld [vmem:[#allocation7 + $0x94] sm:$0xf0] }
  0x45   :  { %798 = vmatpush.bf16.msrb.mxu3 %v1596_v43  ;;  %761 = vmatpush.bf16.msra.mxu0 %v1388_v49  ;;  %v1624_v32 = vor.u32 %v1869_v29, %v1621_v30  ;;  %v1452_v35 = vor.u32 %v1828_v34, %v1451_v33  ;;  %v1817_v36 = vld [vmem:[#allocation7 + $0x44] sm:$0xf]  ;;  %v1413_v37 = vld [vmem:[#allocation7 + $0x48] sm:$0xf0]  ;;  %v1851_v39 = vld [vmem:[#allocation7 + $0x154] sm:$0xf] }
  0x46   :  { %v1416_v38 = vor.u32 %v1817_v36, %v1413_v37  ;;  %v1867_v42 = vld [vmem:[#allocation7 + $0x1d4] sm:$0xf]  ;;  %v1613_v43 = vld [vmem:[#allocation7 + $0x1d8] sm:$0xf0]  ;;  %v1443_v45 = vld [vmem:[#allocation7 + $0x80] sm:$0xf] }
  0x47   :  { %769 = vmatpush.bf16.msra.mxu1 %v1492_v40  ;;  %v1549_v40 = vld [vmem:[#allocation7 + $0x158] sm:$0xf0]  ;;  %v1616_v44 = vor.u32 %v1867_v42, %v1613_v43  ;;  %v1815_v48 = vld [vmem:[#allocation7 + $0x34] sm:$0xf]  ;;  %v1849_v54 = vld [vmem:[#allocation7 + $0x144] sm:$0xf] }
  0x48   :  { %786 = vmatpush.bf16.msrb.mxu2 %v1524_v46  ;;  %v1552_v41 = vor.u32 %v1851_v39, %v1549_v40  ;;  %v1826_v46 = vld [vmem:[#allocation7 + $0x84] sm:$0xf0]  ;;  %v1405_v49 = vld [vmem:[#allocation7 + $0x38] sm:$0xf0]  ;;  %v1839_v50 = vld [vmem:[#allocation7 + $0xf4] sm:$0xf] }
  0x49   :  { %799 = vmatpush.bf16.msrb.mxu3 %v1588_v57  ;;  %762 = vmatpush.bf16.msra.mxu0 %v1380_v51  ;;  %v1444_v47 = vor.u32 %v1826_v46, %v1443_v45  ;;  %v1408_v52 = vor.u32 %v1815_v48, %v1405_v49  ;;  %v1541_v55 = vld [vmem:[#allocation7 + $0x148] sm:$0xf0]  ;;  %v1865_v58 = vld [vmem:[#allocation7 + $0x1c4] sm:$0xf]  ;;  %v1533_v3 = vld [vmem:[#allocation7 + $0x138] sm:$0xf0] }
  0x4a   :  { %v1544_v57 = vor.u32 %v1849_v54, %v1541_v55  ;;  %v1605_v59 = vld [vmem:[#allocation7 + $0x1c8] sm:$0xf0]  ;;  %v1837_v51 = vld [vmem:[#allocation7 + $0xe4] sm:$0xf]  ;;  %v1597_v6 = vld [vmem:[#allocation7 + $0x1b8] sm:$0xf0] }
  0x4b   :  { %770 = vmatpush.bf16.msra.mxu1 %v1484_v53  ;;  %v1501_v53 = vld [vmem:[#allocation7 + $0xf8] sm:$0xf0]  ;;  %v1608_v60 = vor.u32 %v1865_v58, %v1605_v59  ;;  %v1397_v62 = vld [vmem:[#allocation7 + $0x28] sm:$0xf0]  ;;  %v1835_v11 = vld [vmem:[#allocation7 + $0xd4] sm:$0xf] }
  0x4c   :  { %787 = vmatpush.bf16.msrb.mxu2 %v1516_v61  ;;  %v1504_v56 = vor.u32 %v1839_v50, %v1501_v53  ;;  %v1813_v61 = vld [vmem:[#allocation7 + $0x24] sm:$0xf]  ;;  %v1389_v9 = vld [vmem:[#allocation7 + $0x18] sm:$0xf0]  ;;  %v1525_v15 = vld [vmem:[#allocation7 + $0x128] sm:$0xf0] }
  0x4d   :  { %807 = vmatpush.bf16.msrb.mxu0 %v1440_v1  ;;  %800 = vmatpush.bf16.msrb.mxu3 %v1580_v2  ;;  %v1400_v63 = vor.u32 %v1813_v61, %v1397_v62  ;;  %v1847_v2 = vld [vmem:[#allocation7 + $0x134] sm:$0xf]  ;;  %v1845_v14 = vld [vmem:[#allocation7 + $0x124] sm:$0xf]  ;;  %v1589_v18 = vld [vmem:[#allocation7 + $0x1a8] sm:$0xf0] }
  0x4e   :  { %v1536_v4 = vor.u32 %v1847_v2, %v1533_v3  ;;  %v2262_v19 = vld [vmem:[#allocation5] sm:$0x77]  ;;  %v1381_v22 = vld [vmem:[#allocation7 + $0x8] sm:$0xf0]  ;;  %v1517_v28 = vld [vmem:[#allocation7 + $0x118] sm:$0xf0] }
  0x4f   :  { %771 = vmatpush.bf16.msra.mxu1 %v1476_v0  ;;  %v1493_v0 = vld [vmem:[#allocation7 + $0xe8] sm:$0xf0]  ;;  %v1843_v27 = vld [vmem:[#allocation7 + $0x114] sm:$0xf]  ;;  %v175_v30 = vperm.slane %v2262_v19, 0  ;;  %v327_v46 = vperm.slane %v2262_v19, 1 }
  0x50   :  { %788 = vmatpush.bf16.msrb.mxu2 %v1508_v12  ;;  %v1496_v1 = vor.u32 %v1837_v51, %v1493_v0  ;;  %v1485_v12 = vld [vmem:[#allocation7 + $0xd8] sm:$0xf0]  ;;  %v1477_v25 = vld [vmem:[#allocation7 + $0xc8] sm:$0xf0]  ;;  %v1859_v29 = vld [vmem:[#allocation7 + $0x194] sm:$0xf] }
  0x51   :  { %808 = vmatpush.bf16.msrb.mxu0 %v1432_v8  ;;  %801 = vmatpush.bf16.msrb.mxu3 %v1572_v16  ;;  %v1811_v8 = vld [vmem:[#allocation7 + $0x14] sm:$0xf]  ;;  %v1488_v13 = vor.u32 %v1835_v11, %v1485_v12  ;;  %v1528_v16 = vor.u32 %v1845_v14, %v1525_v15  ;;  %v155_v33 = vld [vmem:[#allocation5 + $0x8] sm:$0x77]  ;;  %v1509_v39 = vld [vmem:[#allocation7 + $0x108] sm:$0xf0] }
  0x52   :  { %v1392_v10 = vor.u32 %v1811_v8, %v1389_v9  ;;  %v1469_v36 = vld [vmem:[#allocation7 + $0xb8] sm:$0xf0]  ;;  %v1857_v40 = vld [vmem:[#allocation7 + $0x184] sm:$0xf]  ;;  %v1573_v42 = vld [vmem:[#allocation7 + $0x188] sm:$0xf0] }
  0x53   :  { %772 = vmatpush.bf16.msra.mxu1 %v1468_v5  ;;  %v1863_v5 = vld [vmem:[#allocation7 + $0x1b4] sm:$0xf]  ;;  %v1829_v43 = vld [vmem:[#allocation7 + $0xa4] sm:$0xf]  ;;  %v183_v45 = vperm.slane %v175_v30, 0  ;;  %v177_v48 = vperm.slane %v155_v33, 0 }
  0x54   :  { %833 = vmatpush.bf16.msra.mxu2 %v1568_v17  ;;  %v1600_v7 = vor.u32 %v1863_v5, %v1597_v6  ;;  %v1861_v17 = vld [vmem:[#allocation7 + $0x1a4] sm:$0xf]  ;;  %v178_v49 = vperm.slane %v155_v33, 4  ;;  %v343_v50 = vperm.slane %v2262_v19, 2  ;;  %v335_v55 = vperm.slane %v327_v46, 1  ;;  %v1875_v46 = vld [vmem:[#allocation8 + $0x10] sm:$0xff] }
  0x55   :  { %846 = vmatpush.bf16.msra.mxu3 %v1632_v21  ;;  %809 = vmatpush.bf16.msrb.mxu0 %v1424_v26  ;;  %v1592_v20 = vor.u32 %v1861_v17, %v1589_v18  ;;  %v1809_v21 = vld [vmem:[#allocation7 + $0x4] sm:$0xf]  ;;  %v1453_v58 = vld [vmem:[#allocation7 + $0x98] sm:$0xf0]  ;;  %v330_v51 = vperm.slane %v155_v33, 5  ;;  %v345_v3 = vperm.slane %v155_v33, 2 }
  0x56   :  { %v1384_v23 = vor.u32 %v1809_v21, %v1381_v22  ;;  %v351_v61 = vperm.slane %v343_v50, 2  ;;  %v1825_v0 = vld [vmem:[#allocation7 + $0x84] sm:$0xf]  ;;  %v176_v15 = vperm.slane %v2262_v19, 4  ;;  %s1294_s14 = sshll.u32 %s2145_s30, 4  ;;  %s1296_s1 = sshll.u32 %s2301_s13, 4  ;;  %s1295_s14 = int_to_ptr.vmem [resolvable:$true] %s1294_s14  ;;  %s1297_s1 = int_to_ptr.hbm [resolvable:$true] %s1296_s1 }
  0x57   :  { %773 = vmatpush.bf16.msra.mxu1 %v1460_v24  ;;  %v1833_v24 = vld [vmem:[#allocation7 + $0xc4] sm:$0xf]  ;;  %v338_v12 = vperm.slane %v330_v51, 1  ;;  %v353_v18 = vperm.slane %v345_v3, 2 }
  0x58   :  { %834 = vmatpush.bf16.msra.mxu2 %v1560_v31  ;;  %v1480_v26 = vor.u32 %v1833_v24, %v1477_v25  ;;  %v1520_v31 = vor.u32 %v1843_v27, %v1517_v28  ;;  %v328_v24 = vperm.slane %v2262_v19, 5  ;;  %v1873_v50 = vld [vmem:[#allocation8] sm:$0xff] }
  0x59   :  { %847 = vmatpush.bf16.msra.mxu3 %v1624_v32  ;;  %810 = vmatpush.bf16.msrb.mxu0 %v1416_v38  ;;  %v1581_v32 = vld [vmem:[#allocation7 + $0x198] sm:$0xf0]  ;;  %v1841_v38 = vld [vmem:[#allocation7 + $0x104] sm:$0xf] }
  0x5a   :  { %v1584_v34 = vor.u32 %v1859_v29, %v1581_v32  ;;  %v344_v29 = vperm.slane %v2262_v19, 6  ;;  %v1879_v19 = vld [vmem:[#allocation8 + $0x30] sm:$0xff] }
  0x5b   :  { %774 = vmatpush.bf16.msra.mxu1 %v1452_v35  ;;  %v1831_v35 = vld [vmem:[#allocation7 + $0xb4] sm:$0xf] }
  0x5c   :  { %835 = vmatpush.bf16.msra.mxu2 %v1552_v41  ;;  %v1472_v37 = vor.u32 %v1831_v35, %v1469_v36  ;;  %v1512_v41 = vor.u32 %v1841_v38, %v1509_v39  ;;  %v352_v36 = vperm.slane %v344_v29, 2 }
  0x5d   :  { %848 = vmatpush.bf16.msra.mxu3 %v1616_v44  ;;  %811 = vmatpush.bf16.msrb.mxu0 %v1408_v52  ;;  %v1461_v44 = vld [vmem:[#allocation7 + $0xa8] sm:$0xf0] }
  0x5e   :  { %v1464_v52 = vor.u32 %v1829_v43, %v1461_v44  ;;  %v1877_v43 = vld [vmem:[#allocation8 + $0x20] sm:$0xff]  ;;  %v1876_v44 = vld [vmem:[#allocation8 + $0x18] sm:$0xff] }
  0x5f   :  { %775 = vmatpush.bf16.msra.mxu1 %v1444_v47  ;;  %v1576_v47 = vor.u32 %v1857_v40, %v1573_v42  ;;  %v1878_v42 = vld [vmem:[#allocation8 + $0x28] sm:$0xff] }
  0x60   :  { %836 = vmatpush.bf16.msra.mxu2 %v1544_v57  ;;  %v1827_v57 = vld [vmem:[#allocation7 + $0x94] sm:$0xf] }
  0x61   :  { %849 = vmatpush.bf16.msra.mxu3 %v1608_v60  ;;  %812 = vmatpush.bf16.msrb.mxu0 %v1400_v63  ;;  %v186_v60 = vperm.slane %v178_v49, 0  ;;  %v1456_v62 = vor.u32 %v1827_v57, %v1453_v58  ;;  %v329_v63 = vperm.slane %v155_v33, 1  ;;  %v1886_v49 = vld [vmem:[#allocation8 + $0x68] sm:$0xff] }
  0x62   :  { %v1882_v58 = vld [vmem:[#allocation8 + $0x48] sm:$0xff] }
  0x63   :  { %820 = vmatpush.bf16.msrb.mxu1 %v1504_v56  ;;  %v185_v56 = vperm.slane %v177_v48, 0  ;;  %v1874_v48 = vld [vmem:[#allocation8 + $0x8] sm:$0xff] }
  0x64   :  { %837 = vmatpush.bf16.msra.mxu2 %v1536_v4  ;;  %v346_v4 = vperm.slane %v155_v33, 6 }
  0x65   :  { %850 = vmatpush.bf16.msra.mxu3 %v1600_v7  ;;  %813 = vmatpush.bf16.msrb.mxu0 %v1392_v10  ;;  %v337_v10 = vperm.slane %v329_v63, 1 }
  0x67   :  { %821 = vmatpush.bf16.msrb.mxu1 %v1496_v1  ;;  %v1445_v1 = vld [vmem:[#allocation7 + $0x88] sm:$0xf0] }
  0x68   :  { %838 = vmatpush.bf16.msra.mxu2 %v1528_v16  ;;  %v1448_v8 = vor.u32 %v1825_v0, %v1445_v1  ;;  %v1896_v0 = vld [vmem:[#allocation10 + $0x38] sm:$0xff] }
  0x69   :  { %851 = vmatpush.bf16.msra.mxu3 %v1592_v20  ;;  %814 = vmatpush.bf16.msrb.mxu0 %v1384_v23  ;;  %v354_v20 = vperm.slane %v346_v4, 2  ;;  %v184_v23 = vperm.slane %v176_v15, 0 }
  0x6b   :  { %822 = vmatpush.bf16.msrb.mxu1 %v1488_v13 }
  0x6c   :  { %839 = vmatpush.bf16.msra.mxu2 %v1520_v31 }
  0x6d   :  { %852 = vmatpush.bf16.msra.mxu3 %v1584_v34  ;;  %v336_v34 = vperm.slane %v328_v24, 1 }
  0x6f   :  { %823 = vmatpush.bf16.msrb.mxu1 %v1480_v26 }
  0x70   :  { %840 = vmatpush.bf16.msra.mxu2 %v1512_v41  ;;  %v1880_v41 = vld [vmem:[#allocation8 + $0x38] sm:$0xff] }
  0x71   :  { %853 = vmatpush.bf16.msra.mxu3 %v1576_v47  ;;  %v1887_v47 = vld [vmem:[#allocation8 + $0x70] sm:$0xff] }
  0x73   :  { %824 = vmatpush.bf16.msrb.mxu1 %v1472_v37 }
  0x77   :  { %825 = vmatpush.bf16.msrb.mxu1 %v1464_v52  ;;  %v1885_v52 = vld [vmem:[#allocation8 + $0x60] sm:$0xff] }
  0x7b   :  { %826 = vmatpush.bf16.msrb.mxu1 %v1456_v62 }
  0x7f   :  { %827 = vmatpush.bf16.msrb.mxu1 %v1448_v8 }
  0xaf   :  { %v280_v53 = vpop.f32.mrf.mxu1 }
  0xb0   :  { %v281_v54 = vadd.f32 %v280_v53, %v183_v45  ;;  %v1888_v45 = vld [vmem:[#allocation8 + $0x78] sm:$0xff] }
  0xb1   :  { %v1884_v53 = vld [vmem:[#allocation8 + $0x58] sm:$0xff] }
  0xb2   :  { %v323_v59 = vmax.f32 %v281_v54, 0.0 }
  0xb4   :  { %v339_v2 = vmul.f32 %v335_v55, %v323_v59  ;;  %v1883_v55 = vld [vmem:[#allocation8 + $0x50] sm:$0xff] }
  0xb6   :  { %v306_v5 = vpop.f32.mrf.mxu2  ;;  %v355_v7 = vadd.f32 %v351_v61, %v339_v2 }
  0xb7   :  { %v319_v6 = vpop.f32.mrf.mxu3  ;;  %v307_v9 = vadd.f32 %v306_v5, %v185_v56  ;;  %v282_v13 = vpop.f32.mrf.mxu1  ;;  %v359_v56 = vld [vmem:[%s2292_s4] sm:$0x77] }
  0xb8   :  { %v320_v11 = vadd.f32 %v319_v6, %v186_v60  ;;  %v360_v14 = vpack.c.bf16 %v355_v7, %v355_v7  ;;  %v429_v57 = vperm.slane %v359_v56, 0  ;;  %v1881_v60 = vld [vmem:[#allocation8 + $0x40] sm:$0xff]  ;;  %v861_v4 = vperm.slane %v359_v56, 1 }
  0xb9   :  { %v325_v16 = vmax.f32 %v307_v9, 0.0  ;;  %v869_v6 = vperm.slane %v359_v56, 2 }
  0xba   :  { %v326_v17 = vmax.f32 %v320_v11, 0.0  ;;  %763 = vmatmul.bf16.vlgmr.msra.gmra.mxu0 %v360_v14  ;;  %v433_v61 = vperm.slane %v429_v57, 0  ;;  %v865_v8 = vperm.slane %v861_v4, 1  ;;  %v1911_v4 = vld [vmem:[#allocation13 + $0x30] sm:$0xff] }
  0xbb   :  { %v341_v21 = vmul.f32 %v337_v10, %v325_v16  ;;  %1009 = vmatpush.bf16.msra.mxu0 %v1880_v41  ;;  %v873_v13 = vperm.slane %v869_v6, 2  ;;  %v1893_v41 = vld [vmem:[#allocation10 + $0x20] sm:$0xff] }
  0xbc   :  { %v342_v22 = vmul.f32 %v338_v12, %v326_v17  ;;  %v430_v12 = vperm.slane %v359_v56, 4  ;;  %v1909_v6 = vld [vmem:[#allocation13 + $0x20] sm:$0xff] }
  0xbd   :  { %v357_v25 = vadd.f32 %v353_v18, %v341_v21 }
  0xbe   :  { %v358_v26 = vadd.f32 %v354_v20, %v342_v22  ;;  %v308_v27 = vpop.f32.mrf.mxu2  ;;  %v434_v17 = vperm.slane %v430_v12, 0 }
  0xbf   :  { %v321_v28 = vpop.f32.mrf.mxu3  ;;  %v293_v30 = vpop.f32.mrf.mxu1  ;;  %v362_v31 = vpack.c.bf16 %v357_v25, %v357_v25  ;;  %1010 = vmatpush.bf16.msra.mxu0 %v1879_v19  ;;  %v1892_v19 = vld [vmem:[#allocation10 + $0x18] sm:$0xff] }
  0xc0   :  { %v363_v32 = vpack.c.bf16 %v358_v26, %v358_v26  ;;  %v294_v33 = vadd.f32 %v293_v30, %v184_v23  ;;  %v862_v26 = vperm.slane %v359_v56, 5  ;;  %v870_v28 = vperm.slane %v359_v56, 6 }
  0xc1   :  { %789 = vmatmul.bf16.vlgmr.msrb.gmra.mxu2 %v362_v31 }
  0xc2   :  { %802 = vmatmul.bf16.vlgmr.msrb.gmra.mxu3 %v363_v32  ;;  %v324_v35 = vmax.f32 %v294_v33, 0.0  ;;  %1109 = vmatpush.bf16.msrb.mxu2 %v1896_v0  ;;  %v866_v30 = vperm.slane %v862_v26, 1 }
  0xc3   :  { %1011 = vmatpush.bf16.msra.mxu0 %v1878_v42  ;;  %v1891_v42 = vld [vmem:[#allocation10 + $0x10] sm:$0xff] }
  0xc4   :  { %v340_v37 = vmul.f32 %v336_v34, %v324_v35  ;;  %v874_v34 = vperm.slane %v870_v28, 2 }
  0xc6   :  { %v356_v38 = vadd.f32 %v352_v36, %v340_v37 }
  0xc7   :  { %v295_v39 = vpop.f32.mrf.mxu1  ;;  %1012 = vmatpush.bf16.msra.mxu0 %v1877_v43  ;;  %v1890_v43 = vld [vmem:[#allocation10 + $0x8] sm:$0xff] }
  0xc8   :  { %v361_v40 = vpack.c.bf16 %v356_v38, %v356_v38  ;;  %v1895_v39 = vld [vmem:[#allocation10 + $0x30] sm:$0xff] }
  0xc9   :  { %1110 = vmatpush.bf16.msrb.mxu2 %v1895_v39 }
  0xca   :  { %776 = vmatmul.bf16.vlgmr.msra.gmra.mxu1 %v361_v40  ;;  %815 = vmatmul.bf16.vlgmr.msrb.gmra.mxu0 %v360_v14 }
  0xcb   :  { %1013 = vmatpush.bf16.msra.mxu0 %v1876_v44  ;;  %1022 = vmatpush.bf16.msra.mxu1 %v1888_v45  ;;  %v1889_v44 = vld [vmem:[#allocation10] sm:$0xff]  ;;  %v1904_v45 = vld [vmem:[#allocation11 + $0x38] sm:$0xff] }
  0xcc   :  { %1192 = vmatpush.bf16.msrb.mxu3 %v1904_v45 }
  0xcf   :  { %1014 = vmatpush.bf16.msra.mxu0 %v1875_v46  ;;  %1023 = vmatpush.bf16.msra.mxu1 %v1887_v47  ;;  %v1903_v46 = vld [vmem:[#allocation11 + $0x30] sm:$0xff] }
  0xd0   :  { %1193 = vmatpush.bf16.msrb.mxu3 %v1903_v46 }
  0xd1   :  { %841 = vmatmul.bf16.vlgmr.msra.gmra.mxu2 %v362_v31 }
  0xd2   :  { %854 = vmatmul.bf16.vlgmr.msra.gmra.mxu3 %v363_v32 }
  0xd3   :  { %1015 = vmatpush.bf16.msra.mxu0 %v1874_v48  ;;  %1024 = vmatpush.bf16.msra.mxu1 %v1886_v49  ;;  %v1902_v48 = vld [vmem:[#allocation11 + $0x28] sm:$0xff]  ;;  %v1901_v49 = vld [vmem:[#allocation11 + $0x20] sm:$0xff] }
  0xd4   :  { %1194 = vmatpush.bf16.msrb.mxu3 %v1902_v48 }
  0xd7   :  { %1016 = vmatpush.bf16.msra.mxu0 %v1873_v50  ;;  %1025 = vmatpush.bf16.msra.mxu1 %v1885_v52  ;;  %v877_v50 = vld [vmem:[%s2294_s6] sm:$0x7] }
  0xd8   :  { %1195 = vmatpush.bf16.msrb.mxu3 %v1901_v49 }
  0xda   :  { %828 = vmatmul.bf16.vlgmr.msrb.gmra.mxu1 %v361_v40  ;;  %v1894_v40 = vld [vmem:[#allocation10 + $0x28] sm:$0xff] }
  0xdb   :  { %1026 = vmatpush.bf16.msra.mxu1 %v1884_v53  ;;  %1111 = vmatpush.bf16.msrb.mxu2 %v1894_v40  ;;  %v1900_v53 = vld [vmem:[#allocation11 + $0x18] sm:$0xff] }
  0xdc   :  { %1196 = vmatpush.bf16.msrb.mxu3 %v1900_v53 }
  0xdf   :  { %1027 = vmatpush.bf16.msra.mxu1 %v1883_v55  ;;  %1112 = vmatpush.bf16.msrb.mxu2 %v1893_v41  ;;  %v1899_v55 = vld [vmem:[#allocation11 + $0x10] sm:$0xff] }
  0xe0   :  { %1197 = vmatpush.bf16.msrb.mxu3 %v1899_v55 }
  0xe3   :  { %1028 = vmatpush.bf16.msra.mxu1 %v1882_v58  ;;  %1113 = vmatpush.bf16.msrb.mxu2 %v1892_v19 }
  0xe7   :  { %1029 = vmatpush.bf16.msra.mxu1 %v1881_v60  ;;  %1114 = vmatpush.bf16.msrb.mxu2 %v1891_v42 }
  0xeb   :  { %1115 = vmatpush.bf16.msrb.mxu2 %v1890_v43 }
  0xef   :  { %1116 = vmatpush.bf16.msrb.mxu2 %v1889_v44 }
 0x137   :  { %v764_v54 = vpop.f32.mrf.mxu0 }
 0x138   :  { %v765_v51 = vadd.f32 %v764_v54, %v433_v61  ;;  %v912_v54 = vperm.slane %v877_v50, 0  ;;  %v1038_v61 = vperm.slane %v877_v50, 2 }
 0x13f   :  { %v766_v59 = vpop.f32.mrf.mxu0 }
 0x140   :  { %v1036_v59 = vperm.slane %v877_v50, 1 }
 0x144   :  { %v790_v62 = vpop.f32.mrf.mxu2 }
 0x145   :  { %v803_v63 = vpop.f32.mrf.mxu3 }
 0x147   :  { %v777_v1 = vpop.f32.mrf.mxu1  ;;  %v816_v2 = vpop.f32.mrf.mxu0 }
 0x148   :  { %v778_v3 = vadd.f32 %v777_v1, %v765_v51  ;;  %v817_v23 = vadd.f32 %v816_v2, %v434_v17  ;;  %v1898_v1 = vld [vmem:[#allocation11 + $0x8] sm:$0xff]  ;;  %v1897_v2 = vld [vmem:[#allocation11] sm:$0xff]  ;;  %v1928_v17 = vld [vmem:[%s2298_s10] ss:$0 sm:$0xff] }
 0x149   :  { %1198 = vmatpush.bf16.msrb.mxu3 %v1898_v1 }
 0x14a   :  { %v791_v5 = vadd.f32 %v790_v62, %v778_v3  ;;  %v1912_v3 = vld [vmem:[#allocation13 + $0x38] sm:$0xff] }
 0x14b   :  { %1275 = vmatpush.bf16.msrb.mxu0 %v1912_v3 }
 0x14c   :  { %v804_v7 = vadd.f32 %v803_v63, %v791_v5  ;;  %v792_v9 = vpop.f32.mrf.mxu2  ;;  %v1910_v5 = vld [vmem:[#allocation13 + $0x28] sm:$0xff] }
 0x14d   :  { %v805_v10 = vpop.f32.mrf.mxu3  ;;  %1199 = vmatpush.bf16.msrb.mxu3 %v1897_v2  ;;  %v1927_v9 = vld [vmem:[%s2296_s8] ss:$0 sm:$0xff] }
 0x14e   :  { %v859_v11 = vmax.f32 %v804_v7, 0.0  ;;  %v1908_v7 = vld [vmem:[#allocation13 + $0x18] sm:$0xff] }
 0x14f   :  { %v779_v14 = vpop.f32.mrf.mxu1  ;;  %v818_v15 = vpop.f32.mrf.mxu0  ;;  %1276 = vmatpush.bf16.msrb.mxu0 %v1911_v4 }
 0x150   :  { %v867_v16 = vmul.f32 %v865_v8, %v859_v11  ;;  %v1907_v8 = vld [vmem:[#allocation13 + $0x10] sm:$0xff]  ;;  %v1906_v15 = vld [vmem:[#allocation13 + $0x8] sm:$0xff] }
 0x152   :  { %v875_v18 = vadd.f32 %v873_v13, %v867_v16  ;;  %v1905_v16 = vld [vmem:[#allocation13] sm:$0xff] }
 0x153   :  { %1277 = vmatpush.bf16.msrb.mxu0 %v1910_v5 }
 0x154   :  { %v842_v20 = vpop.f32.mrf.mxu2  ;;  %v878_v22 = vpack.c.bf16 %v875_v18, %v875_v18 }
 0x155   :  { %v855_v21 = vpop.f32.mrf.mxu3 }
 0x156   :  { %1017 = vmatmul.bf16.vlgmr.msra.gmra.mxu0 %v878_v22 }
 0x157   :  { %v829_v24 = vpop.f32.mrf.mxu1  ;;  %1278 = vmatpush.bf16.msrb.mxu0 %v1909_v6 }
 0x158   :  { %v830_v25 = vadd.f32 %v829_v24, %v817_v23  ;;  %v1929_v24 = vld [vmem:[%s2300_s12] ss:$0 sm:$0xff] }
 0x15a   :  { %v843_v27 = vadd.f32 %v842_v20, %v830_v25 }
 0x15b   :  { %1279 = vmatpush.bf16.msrb.mxu0 %v1908_v7 }
 0x15c   :  { %v856_v29 = vadd.f32 %v855_v21, %v843_v27  ;;  %v844_v31 = vpop.f32.mrf.mxu2 }
 0x15d   :  { %v857_v32 = vpop.f32.mrf.mxu3 }
 0x15e   :  { %v860_v33 = vmax.f32 %v856_v29, 0.0 }
 0x15f   :  { %v831_v35 = vpop.f32.mrf.mxu1  ;;  %1280 = vmatpush.bf16.msrb.mxu0 %v1907_v8 }
 0x160   :  { %v868_v36 = vmul.f32 %v866_v30, %v860_v33 }
 0x162   :  { %v876_v37 = vadd.f32 %v874_v34, %v868_v36 }
 0x163   :  { %1281 = vmatpush.bf16.msrb.mxu0 %v1906_v15 }
 0x164   :  { %v879_v38 = vpack.c.bf16 %v876_v37, %v876_v37 }
 0x166   :  { %1030 = vmatmul.bf16.vlgmr.msra.gmra.mxu1 %v879_v38 }
 0x167   :  { %1282 = vmatpush.bf16.msrb.mxu0 %v1905_v16 }
 0x1d3   :  { %v1018_v47 = vpop.f32.mrf.mxu0 }
 0x1d4   :  { %v1019_v56 = vadd.f32 %v1018_v47, %v912_v54 }
 0x1db   :  { %v1020_v52 = vpop.f32.mrf.mxu0 }
 0x1e3   :  { %v1031_v57 = vpop.f32.mrf.mxu1 }
 0x1e4   :  { %v1032_v58 = vadd.f32 %v1031_v57, %v1019_v56 }
 0x1e6   :  { %v1035_v60 = vmax.f32 %v1032_v58, 0.0 }
 0x1e8   :  { %v1037_v62 = vmul.f32 %v1036_v59, %v1035_v60 }
 0x1ea   :  { %v1039_v63 = vadd.f32 %v1038_v61, %v1037_v62 }
 0x1eb   :  { %v1033_v51 = vpop.f32.mrf.mxu1 }
 0x1ec   :  { %v1040_v0 = vpack.c.bf16 %v1039_v63, %v1039_v63 }
 0x1ee   :  { %1117 = vmatmul.bf16.vlgmr.msrb.gmra.mxu2 %v1040_v0 }
 0x271   :  { %v1118_v10 = vpop.f32.mrf.mxu2 }
 0x272   :  { %v1119_v11 = vadd.f32 %v1927_v9, %v1118_v10 }
 0x274   :  { %v1122_v12 = vmax.f32 %v1119_v11, 0.0 }
 0x276   :  { %v1123_v13 = vpack.c.bf16 %v1122_v12, %v1122_v12 }
 0x278   :  { %1200 = vmatmul.bf16.vlgmr.msrb.gmra.mxu3 %v1123_v13 }
 0x279   :  { %v1120_v14 = vpop.f32.mrf.mxu2 }
 0x2fb   :  { %v1201_v18 = vpop.f32.mrf.mxu3 }
 0x2fc   :  { %v1202_v20 = vadd.f32 %v1928_v17, %v1201_v18 }
 0x2fe   :  { %v1205_v21 = vmax.f32 %v1202_v20, 0.0 }
 0x300   :  { %v1206_v22 = vpack.c.bf16 %v1205_v21, %v1205_v21 }
 0x302   :  { %1283 = vmatmul.bf16.vlgmr.msrb.gmra.mxu0 %v1206_v22 }
 0x303   :  { %v1203_v23 = vpop.f32.mrf.mxu3 }
 0x37f   :  { %v1284_v25 = vpop.f32.mrf.mxu0 }
 0x380   :  { %v1285_v26 = vadd.f32 %v1929_v24, %v1284_v25 }
 0x382   :  { %1288 = vst [vmem:[#allocation14] sm:$0x3] %v1285_v26 }
 0x383   :  { %1299 = dma.vmem_to_hbm [thread:$0]  %s1295_s14, 32, %s1297_s1, [#allocation4]  }
 0x387   :  { %v1286_v27 = vpop.f32.mrf.mxu0 }
 0x388   :  { %2130 = dma.done.wait [#allocation4], 32  }
 0x389   :  { %2131 = vsyncadd [#allocation4], 4294967264 }
 0x38a   :  { %1304 = vsyncpa [#allocation3], 1 }
 0x38b   :  { %1305 = vsyncpa [#allocation6], 1 }
 0x38c   :  { %1306 = vsyncpa [#allocation9], 1 }
 0x38d   :  { %1307 = vsyncpa [#allocation12], 1 }
 0x38e   :  { %1308 = vsyncpa [#allocation4], 1 }

// kernel: cnn_forward.1
= control target key start
LH: loop header
LB: loop body
LE: loop exit
PB: predicated region body
PF: predicated region fallthrough
CT: control target
= control target key end

     0   :  { %18 = vsyncpa [#allocation3], 0  ;;  %s2288_s0 = inlined_call_operand.vmem [shape: f32[2,64], index: 0, kind: input, shape index: {}]   ;;  %s2289_s1 = inlined_call_operand.hbm [shape: bf16[64,512], index: 1, kind: input, shape index: {}]   ;;  %s2290_s2 = inlined_call_operand.hbm [shape: f32[3,512], index: 2, kind: input, shape index: {}]   ;;  %s2291_s3 = inlined_call_operand.hbm [shape: bf16[512,256], index: 3, kind: input, shape index: {}]   ;;  %s2292_s4 = inlined_call_operand.vmem [shape: f32[3,256], index: 4, kind: input, shape index: {}]   ;;  %s2293_s5 = inlined_call_operand.hbm [shape: bf16[256,128], index: 5, kind: input, shape index: {}]   ;;  %s2294_s6 = inlined_call_operand.vmem [shape: f32[3,128], index: 6, kind: input, shape index: {}]   ;;  %s2295_s7 = inlined_call_operand.hbm [shape: bf16[128,128], index: 7, kind: input, shape index: {}]   ;;  %s2296_s8 = inlined_call_operand.vmem [shape: f32[1,128], index: 8, kind: input, shape index: {}]   ;;  %s2297_s9 = inlined_call_operand.hbm [shape: bf16[128,128], index: 9, kind: input, shape index: {}]   ;;  %s2298_s10 = inlined_call_operand.vmem [shape: f32[1,128], index: 10, kind: input, shape index: {}]   ;;  %s2299_s11 = inlined_call_operand.hbm [shape: bf16[128,128], index: 11, kind: input, shape index: {}]   ;;  %s2300_s12 = inlined_call_operand.vmem [shape: f32[1,128], index: 12, kind: input, shape index: {}]   ;;  %s2301_s13 = inlined_call_operand.hbm [shape: f32[2,128], index: 13, kind: output, shape index: {}]  }
   0x1   :  { %19 = vsyncpa [#allocation6], 0 }
   0x2   :  { %20 = vsyncpa [#allocation9], 0 }
   0x3   :  { %21 = vsyncpa [#allocation12], 0  ;;  %s43_s27 = sshll.u32 %s2290_s2, 4  ;;  %s44_s27 = int_to_ptr.hbm [resolvable:$true] %s43_s27 }
   0x4   :  { %22 = vsyncpa [#allocation4], 0  ;;  %s2132_s28 = smov [#allocation5]   ;;  %s68_s15 = sshll.u32 %s2293_s5, 4  ;;  %s69_s15 = int_to_ptr.hbm [resolvable:$true] %s68_s15 }
   0x5   :  { %s45_s29 = sshll.u32 %s2132_s28, 4  ;;  %s2133_s16 = smov [#allocation8]   ;;  %s46_s29 = int_to_ptr.vmem [resolvable:$true] %s45_s29 }
   0x6   :  { %48 = dma.hbm_to_vmem [thread:$0]  %s44_s27, 256, %s46_s29, [#allocation6]  }
   0x7   :  { %s70_s17 = sshll.u32 %s2133_s16, 4  ;;  %s2134_s18 = smov 64   ;;  %s71_s17 = int_to_ptr.vmem [resolvable:$true] %s70_s17 }
   0x8   :  { %s2135_s19 = smov 4   ;;  %s98_s21 = sshll.u32 %s2297_s9, 4  ;;  %s99_s21 = int_to_ptr.hbm [resolvable:$true] %s98_s21 }
   0x9   :  { %76 = dma.hbm_to_vmem [thread:$0]  %s69_s15, 2048, %s71_s17, [#allocation9], %s2134_s18, %s2134_s18, %s2135_s19  }
   0xa   :  { %s2136_s22 = smov [#allocation11]   ;;  %s29_s25 = sshll.u32 %s2289_s1, 4  ;;  %s30_s25 = int_to_ptr.hbm [resolvable:$true] %s29_s25 }
   0xb   :  { %s100_s23 = sshll.u32 %s2136_s22, 4  ;;  %s2137_s26 = smov [#allocation2]   ;;  %s101_s23 = int_to_ptr.vmem [resolvable:$true] %s100_s23 }
   0xc   :  { %106 = dma.hbm_to_vmem [thread:$0]  %s99_s21, 1024, %s101_s23, [#allocation12], %s2134_s18, %s2134_s18, %s2135_s19  }
   0xd   :  { %s31_s27 = sshll.u32 %s2137_s26, 4  ;;  %s2138_s28 = smov 256   ;;  %s32_s27 = int_to_ptr.vmem [resolvable:$true] %s31_s27 }
   0xe   :  { %s2139_s29 = smov 16   ;;  %s53_s14 = sshll.u32 %s2291_s3, 4  ;;  %s54_s14 = int_to_ptr.hbm [resolvable:$true] %s53_s14 }
   0xf   :  { %37 = dma.hbm_to_vmem [thread:$0]  %s30_s25, 2048, %s32_s27, [#allocation3], %s2138_s28, %s2138_s28, %s2139_s29  }
  0x10   :  { %s2140_s15 = smov [#allocation7]   ;;  %s83_s2 = sshll.u32 %s2295_s7, 4  ;;  %s84_s2 = int_to_ptr.hbm [resolvable:$true] %s83_s2 }
  0x11   :  { %s55_s16 = sshll.u32 %s2140_s15, 4  ;;  %s2141_s20 = smov 128   ;;  %s56_s16 = int_to_ptr.vmem [resolvable:$true] %s55_s16 }
  0x12   :  { %s2142_s21 = smov 8   ;;  %s2143_s22 = smov [#allocation10]  }
  0x13   :  { %61 = dma.hbm_to_vmem [thread:$0]  %s54_s14, 8192, %s56_s16, [#allocation6], %s2141_s20, %s2141_s20, %s2142_s21  }
  0x14   :  { %s85_s23 = sshll.u32 %s2143_s22, 4  ;;  %s113_s25 = sshll.u32 %s2299_s11, 4  ;;  %s86_s23 = int_to_ptr.vmem [resolvable:$true] %s85_s23  ;;  %s114_s25 = int_to_ptr.hbm [resolvable:$true] %s113_s25 }
  0x15   :  { %91 = dma.hbm_to_vmem [thread:$0]  %s84_s2, 1024, %s86_s23, [#allocation9], %s2134_s18, %s2134_s18, %s2135_s19  }
  0x16   :  { %s2144_s3 = smov [#allocation13]  }
  0x17   :  { %s115_s26 = sshll.u32 %s2144_s3, 4  ;;  %s116_s26 = int_to_ptr.vmem [resolvable:$true] %s115_s26 }
  0x18   :  { %121 = dma.hbm_to_vmem [thread:$0]  %s114_s25, 1024, %s116_s26, [#allocation12], %s2134_s18, %s2134_s18, %s2135_s19  }
  0x19   :  { %2122 = dma.done.wait [#allocation3], 2048  }
  0x1a   :  { %2123 = vsyncadd [#allocation3], 4294965248 }
  0x1b   :  { %2124 = dma.done.wait [#allocation6], 8448  }
  0x1c   :  { %2125 = vsyncadd [#allocation6], 4294958848 }
  0x1d   :  { %2126 = dma.done.wait [#allocation9], 3072  }
  0x1e   :  { %2127 = vsyncadd [#allocation9], 4294964224 }
  0x1f   :  { %2128 = dma.done.wait [#allocation12], 2048  }
  0x20   :  { %2129 = vsyncadd [#allocation12], 4294965248  ;;  %v1359_v0 = vld [vmem:[#allocation2 + $0x60] sm:$0xf]  ;;  %v1807_v1 = vld [vmem:[#allocation2 + $0x6c] sm:$0xf0] }
  0x21   :  { %v1367_v2 = vld [vmem:[#allocation2 + $0x68] sm:$0xf]  ;;  %v1360_v3 = vor.u32 %v1807_v1, %v1359_v0  ;;  %v1808_v4 = vld [vmem:[#allocation2 + $0x74] sm:$0xf0]  ;;  %v1806_v5 = vld [vmem:[#allocation2 + $0x6c] sm:$0xf] }
  0x22   :  { %v1369_v6 = vld [vmem:[#allocation2 + $0x78] sm:$0xf0]  ;;  %v1368_v7 = vor.u32 %v1808_v4, %v1367_v2  ;;  %v1343_v9 = vld [vmem:[#allocation2 + $0x40] sm:$0xf]  ;;  %v1803_v10 = vld [vmem:[#allocation2 + $0x4c] sm:$0xf0] }
  0x23   :  { %v1372_v8 = vor.u32 %v1806_v5, %v1369_v6  ;;  %v1351_v11 = vld [vmem:[#allocation2 + $0x48] sm:$0xf]  ;;  %275 = vmatpush.bf16.msra.mxu1 %v1360_v3  ;;  %v1344_v12 = vor.u32 %v1803_v10, %v1343_v9  ;;  %v1804_v13 = vld [vmem:[#allocation2 + $0x54] sm:$0xf0]  ;;  %v1802_v14 = vld [vmem:[#allocation2 + $0x4c] sm:$0xf] }
  0x24   :  { %v1353_v15 = vld [vmem:[#allocation2 + $0x58] sm:$0xf0]  ;;  %301 = vmatpush.bf16.msra.mxu2 %v1368_v7  ;;  %v1352_v16 = vor.u32 %v1804_v13, %v1351_v11  ;;  %v1327_v18 = vld [vmem:[#allocation2 + $0x20] sm:$0xf]  ;;  %v1799_v19 = vld [vmem:[#allocation2 + $0x2c] sm:$0xf0] }
  0x25   :  { %314 = vmatpush.bf16.msra.mxu3 %v1372_v8  ;;  %v1356_v17 = vor.u32 %v1802_v14, %v1353_v15  ;;  %v1335_v20 = vld [vmem:[#allocation2 + $0x28] sm:$0xf]  ;;  %v1800_v21 = vld [vmem:[#allocation2 + $0x34] sm:$0xf0]  ;;  %v1798_v22 = vld [vmem:[#allocation2 + $0x2c] sm:$0xf]  ;;  %v1328_v24 = vor.u32 %v1799_v19, %v1327_v18 }
  0x26   :  { %v1337_v23 = vld [vmem:[#allocation2 + $0x38] sm:$0xf0]  ;;  %v1336_v25 = vor.u32 %v1800_v21, %v1335_v20  ;;  %v1311_v27 = vld [vmem:[#allocation2] sm:$0xf]  ;;  %v1795_v28 = vld [vmem:[#allocation2 + $0xc] sm:$0xf0] }
  0x27   :  { %276 = vmatpush.bf16.msra.mxu1 %v1344_v12  ;;  %v1340_v26 = vor.u32 %v1798_v22, %v1337_v23  ;;  %v1319_v29 = vld [vmem:[#allocation2 + $0x8] sm:$0xf]  ;;  %v1796_v30 = vld [vmem:[#allocation2 + $0x14] sm:$0xf0]  ;;  %v1794_v31 = vld [vmem:[#allocation2 + $0xc] sm:$0xf]  ;;  %v1312_v36 = vor.u32 %v1795_v28, %v1311_v27 }
  0x28   :  { %302 = vmatpush.bf16.msra.mxu2 %v1352_v16  ;;  %v1321_v32 = vld [vmem:[#allocation2 + $0x18] sm:$0xf0]  ;;  %v153_v33 = vld [vmem:[%s2288_s0] sm:$0x3]  ;;  %v1805_v34 = vld [vmem:[#allocation2 + $0x64] sm:$0xf]  ;;  %v1320_v40 = vor.u32 %v1796_v30, %v1319_v29 }
  0x29   :  { %315 = vmatpush.bf16.msra.mxu3 %v1356_v17  ;;  %v1361_v35 = vld [vmem:[#allocation2 + $0x70] sm:$0xf0]  ;;  %v1435_v37 = vld [vmem:[#allocation7 + $0x70] sm:$0xf]  ;;  %v1824_v38 = vld [vmem:[#allocation7 + $0x74] sm:$0xf0]  ;;  %v1324_v41 = vor.u32 %v1794_v31, %v1321_v32  ;;  %v2252_v51 = vpack.c.bf16 %v153_v33, %v153_v33 }
  0x2a   :  { %v1427_v39 = vld [vmem:[#allocation7 + $0x60] sm:$0xf]  ;;  %v1436_v42 = vor.u32 %v1824_v38, %v1435_v37  ;;  %v1822_v43 = vld [vmem:[#allocation7 + $0x64] sm:$0xf0]  ;;  %v1563_v44 = vld [vmem:[#allocation7 + $0x170] sm:$0xf]  ;;  %v1364_v46 = vor.u32 %v1805_v34, %v1361_v35 }
  0x2b   :  { %277 = vmatpush.bf16.msra.mxu1 %v1328_v24  ;;  %v1856_v45 = vld [vmem:[#allocation7 + $0x174] sm:$0xf0]  ;;  %v1801_v47 = vld [vmem:[#allocation2 + $0x44] sm:$0xf]  ;;  %v1627_v49 = vld [vmem:[#allocation7 + $0x1f0] sm:$0xf]  ;;  %v1428_v53 = vor.u32 %v1822_v43, %v1427_v39 }
  0x2c   :  { %303 = vmatpush.bf16.msra.mxu2 %v1336_v25  ;;  %v1564_v48 = vor.u32 %v1856_v45, %v1563_v44  ;;  %v1872_v50 = vld [vmem:[#allocation7 + $0x1f4] sm:$0xf0]  ;;  %v1345_v52 = vld [vmem:[#allocation2 + $0x50] sm:$0xf0]  ;;  %755 = vmatpush.bf16.msra.mxu0 %v1436_v42  ;;  %v1555_v54 = vld [vmem:[#allocation7 + $0x160] sm:$0xf] }
  0x2d   :  { %316 = vmatpush.bf16.msra.mxu3 %v1340_v26  ;;  %v1854_v55 = vld [vmem:[#allocation7 + $0x164] sm:$0xf0]  ;;  %vm267_vm0 = vcmask 523264   ;;  %v1419_v56 = vld [vmem:[#allocation7 + $0x50] sm:$0xf]  ;;  %v1628_v58 = vor.u32 %v1872_v50, %v1627_v49  ;;  %v1348_v59 = vor.u32 %v1801_v47, %v1345_v52  ;;  %s2145_s30 = smov [#allocation14]  }
  0x2e   :  { %v1820_v57 = vld [vmem:[#allocation7 + $0x54] sm:$0xf0]  ;;  %v1797_v60 = vld [vmem:[#allocation2 + $0x24] sm:$0xf]  ;;  %v1556_v61 = vor.u32 %v1854_v55, %v1555_v54  ;;  %v1619_v62 = vld [vmem:[#allocation7 + $0x1e0] sm:$0xf] }
  0x2f   :  { %278 = vmatpush.bf16.msra.mxu1 %v1312_v36  ;;  %v1870_v63 = vld [vmem:[#allocation7 + $0x1e4] sm:$0xf0]  ;;  %v1329_v0 = vld [vmem:[#allocation2 + $0x30] sm:$0xf0]  ;;  %v1420_v1 = vor.u32 %v1820_v57, %v1419_v56  ;;  %v1547_v2 = vld [vmem:[#allocation7 + $0x150] sm:$0xf] }
  0x30   :  { %304 = vmatpush.bf16.msra.mxu2 %v1320_v40  ;;  %756 = vmatpush.bf16.msra.mxu0 %v1428_v53  ;;  %v1852_v3 = vld [vmem:[#allocation7 + $0x154] sm:$0xf0]  ;;  %v1411_v4 = vld [vmem:[#allocation7 + $0x40] sm:$0xf]  ;;  %v1818_v5 = vld [vmem:[#allocation7 + $0x44] sm:$0xf0]  ;;  %v1620_v7 = vor.u32 %v1870_v63, %v1619_v62  ;;  %v1332_v8 = vor.u32 %v1797_v60, %v1329_v0 }
  0x31   :  { %317 = vmatpush.bf16.msra.mxu3 %v1324_v41  ;;  %v1793_v6 = vld [vmem:[#allocation2 + $0x4] sm:$0xf]  ;;  %v1313_v9 = vld [vmem:[#allocation2 + $0x10] sm:$0xf0]  ;;  %v1548_v10 = vor.u32 %v1852_v3, %v1547_v2  ;;  %v1611_v11 = vld [vmem:[#allocation7 + $0x1d0] sm:$0xf]  ;;  %v1412_v13 = vor.u32 %v1818_v5, %v1411_v4 }
  0x32   :  { %1373 = vmatmul.msk.bf16.vlgmr.msra.gmra.mxu1 %vm267_vm0, %v2252_v51  ;;  %v1868_v12 = vld [vmem:[#allocation7 + $0x1d4] sm:$0xf0]  ;;  %v1403_v14 = vld [vmem:[#allocation7 + $0x30] sm:$0xf]  ;;  %v1539_v15 = vld [vmem:[#allocation7 + $0x140] sm:$0xf]  ;;  %v1316_v21 = vor.u32 %v1793_v6, %v1313_v9 }
  0x33   :  { %288 = vmatpush.bf16.msrb.mxu1 %v1364_v46  ;;  %1375 = vmatmul.msk.bf16.vlgmr.msra.gmra.mxu2 %vm267_vm0, %v2252_v51  ;;  %v1850_v16 = vld [vmem:[#allocation7 + $0x144] sm:$0xf0]  ;;  %v1816_v17 = vld [vmem:[#allocation7 + $0x34] sm:$0xf0]  ;;  %v1499_v18 = vld [vmem:[#allocation7 + $0xf0] sm:$0xf]  ;;  %v1612_v20 = vor.u32 %v1868_v12, %v1611_v11 }
  0x34   :  { %781 = vmatpush.bf16.msrb.mxu2 %v1564_v48  ;;  %1376 = vmatmul.msk.bf16.vlgmr.msra.gmra.mxu3 %vm267_vm0, %v2252_v51  ;;  %v1840_v19 = vld [vmem:[#allocation7 + $0xf4] sm:$0xf0]  ;;  %v1540_v22 = vor.u32 %v1850_v16, %v1539_v15  ;;  %v1603_v23 = vld [vmem:[#allocation7 + $0x1c0] sm:$0xf]  ;;  %v1866_v24 = vld [vmem:[#allocation7 + $0x1c4] sm:$0xf0]  ;;  %v1404_v25 = vor.u32 %v1816_v17, %v1403_v14 }
  0x35   :  { %794 = vmatpush.bf16.msrb.mxu3 %v1628_v58  ;;  %757 = vmatpush.bf16.msra.mxu0 %v1420_v1  ;;  %v1500_v26 = vor.u32 %v1840_v19, %v1499_v18  ;;  %v1531_v27 = vld [vmem:[#allocation7 + $0x130] sm:$0xf]  ;;  %v1848_v28 = vld [vmem:[#allocation7 + $0x134] sm:$0xf0]  ;;  %v1395_v29 = vld [vmem:[#allocation7 + $0x20] sm:$0xf]  ;;  %v1604_v31 = vor.u32 %v1866_v24, %v1603_v23 }
  0x36   :  { %v1814_v30 = vld [vmem:[#allocation7 + $0x24] sm:$0xf0]  ;;  %v1491_v32 = vld [vmem:[#allocation7 + $0xe0] sm:$0xf]  ;;  %v1532_v34 = vor.u32 %v1848_v28, %v1531_v27  ;;  %v1595_v35 = vld [vmem:[#allocation7 + $0x1b0] sm:$0xf] }
  0x37   :  { %289 = vmatpush.bf16.msrb.mxu1 %v1348_v59  ;;  %v1838_v33 = vld [vmem:[#allocation7 + $0xe4] sm:$0xf0]  ;;  %v1864_v36 = vld [vmem:[#allocation7 + $0x1b4] sm:$0xf0]  ;;  %v1523_v37 = vld [vmem:[#allocation7 + $0x120] sm:$0xf]  ;;  %v1396_v38 = vor.u32 %v1814_v30, %v1395_v29 }
  0x38   :  { %782 = vmatpush.bf16.msrb.mxu2 %v1556_v61  ;;  %v1846_v39 = vld [vmem:[#allocation7 + $0x124] sm:$0xf0]  ;;  %v1492_v40 = vor.u32 %v1838_v33, %v1491_v32  ;;  %v1387_v41 = vld [vmem:[#allocation7 + $0x10] sm:$0xf]  ;;  %v1812_v42 = vld [vmem:[#allocation7 + $0x14] sm:$0xf0]  ;;  %v1596_v43 = vor.u32 %v1864_v36, %v1595_v35 }
  0x39   :  { %795 = vmatpush.bf16.msrb.mxu3 %v1620_v7  ;;  %758 = vmatpush.bf16.msra.mxu0 %v1412_v13  ;;  %v1483_v44 = vld [vmem:[#allocation7 + $0xd0] sm:$0xf]  ;;  %v1836_v45 = vld [vmem:[#allocation7 + $0xd4] sm:$0xf0]  ;;  %v1524_v46 = vor.u32 %v1846_v39, %v1523_v37  ;;  %v1587_v47 = vld [vmem:[#allocation7 + $0x1a0] sm:$0xf]  ;;  %v1388_v49 = vor.u32 %v1812_v42, %v1387_v41 }
  0x3a   :  { %v1862_v48 = vld [vmem:[#allocation7 + $0x1a4] sm:$0xf0]  ;;  %v1515_v50 = vld [vmem:[#allocation7 + $0x110] sm:$0xf]  ;;  %v1844_v52 = vld [vmem:[#allocation7 + $0x114] sm:$0xf0]  ;;  %v1484_v53 = vor.u32 %v1836_v45, %v1483_v44 }
  0x3b   :  { %290 = vmatpush.bf16.msrb.mxu1 %v1332_v8  ;;  %v1379_v54 = vld [vmem:[#allocation7] sm:$0xf]  ;;  %v1810_v55 = vld [vmem:[#allocation7 + $0x4] sm:$0xf0]  ;;  %v1588_v57 = vor.u32 %v1862_v48, %v1587_v47  ;;  %v1823_v59 = vld [vmem:[#allocation7 + $0x74] sm:$0xf]  ;;  %v1516_v61 = vor.u32 %v1844_v52, %v1515_v50 }
  0x3c   :  { %783 = vmatpush.bf16.msrb.mxu2 %v1548_v10  ;;  %v1475_v56 = vld [vmem:[#allocation7 + $0xc0] sm:$0xf]  ;;  %v1834_v58 = vld [vmem:[#allocation7 + $0xc4] sm:$0xf0]  ;;  %v1437_v60 = vld [vmem:[#allocation7 + $0x78] sm:$0xf0] }
  0x3d   :  { %796 = vmatpush.bf16.msrb.mxu3 %v1612_v20  ;;  %759 = vmatpush.bf16.msra.mxu0 %v1404_v25  ;;  %v1579_v62 = vld [vmem:[#allocation7 + $0x190] sm:$0xf]  ;;  %v1860_v63 = vld [vmem:[#allocation7 + $0x194] sm:$0xf0]  ;;  %v1476_v0 = vor.u32 %v1834_v58, %v1475_v56  ;;  %v1440_v1 = vor.u32 %v1823_v59, %v1437_v60  ;;  %v1821_v6 = vld [vmem:[#allocation7 + $0x64] sm:$0xf] }
  0x3e   :  { %v1580_v2 = vor.u32 %v1860_v63, %v1579_v62  ;;  %v1467_v3 = vld [vmem:[#allocation7 + $0xb0] sm:$0xf]  ;;  %v1832_v4 = vld [vmem:[#allocation7 + $0xb4] sm:$0xf0]  ;;  %v1429_v7 = vld [vmem:[#allocation7 + $0x68] sm:$0xf0] }
  0x3f   :  { %291 = vmatpush.bf16.msrb.mxu1 %v1316_v21  ;;  %v1468_v5 = vor.u32 %v1832_v4, %v1467_v3  ;;  %v1432_v8 = vor.u32 %v1821_v6, %v1429_v7  ;;  %v1507_v9 = vld [vmem:[#allocation7 + $0x100] sm:$0xf]  ;;  %v1842_v10 = vld [vmem:[#allocation7 + $0x104] sm:$0xf0]  ;;  %v1855_v14 = vld [vmem:[#allocation7 + $0x174] sm:$0xf] }
  0x40   :  { %784 = vmatpush.bf16.msrb.mxu2 %v1540_v22  ;;  %v1571_v11 = vld [vmem:[#allocation7 + $0x180] sm:$0xf]  ;;  %v1508_v12 = vor.u32 %v1842_v10, %v1507_v9  ;;  %v1858_v13 = vld [vmem:[#allocation7 + $0x184] sm:$0xf0]  ;;  %v1565_v15 = vld [vmem:[#allocation7 + $0x178] sm:$0xf0] }
  0x41   :  { %797 = vmatpush.bf16.msrb.mxu3 %v1604_v31  ;;  %760 = vmatpush.bf16.msra.mxu0 %v1396_v38  ;;  %v1572_v16 = vor.u32 %v1858_v13, %v1571_v11  ;;  %v1568_v17 = vor.u32 %v1855_v14, %v1565_v15  ;;  %v1871_v18 = vld [vmem:[#allocation7 + $0x1f4] sm:$0xf]  ;;  %v1629_v19 = vld [vmem:[#allocation7 + $0x1f8] sm:$0xf0]  ;;  %v1459_v20 = vld [vmem:[#allocation7 + $0xa0] sm:$0xf] }
  0x42   :  { %1374 = vmatmul.msk.bf16.vlgmr.msrb.gmra.mxu1 %vm267_vm0, %v2252_v51  ;;  %v1380_v51 = vor.u32 %v1810_v55, %v1379_v54  ;;  %v1632_v21 = vor.u32 %v1871_v18, %v1629_v19  ;;  %v1830_v22 = vld [vmem:[#allocation7 + $0xa4] sm:$0xf0]  ;;  %v1819_v23 = vld [vmem:[#allocation7 + $0x54] sm:$0xf]  ;;  %v1421_v25 = vld [vmem:[#allocation7 + $0x58] sm:$0xf0] }
  0x43   :  { %768 = vmatpush.bf16.msra.mxu1 %v1500_v26  ;;  %v1460_v24 = vor.u32 %v1830_v22, %v1459_v20  ;;  %v1424_v26 = vor.u32 %v1819_v23, %v1421_v25  ;;  %v1853_v27 = vld [vmem:[#allocation7 + $0x164] sm:$0xf]  ;;  %v1557_v28 = vld [vmem:[#allocation7 + $0x168] sm:$0xf0]  ;;  %v1451_v33 = vld [vmem:[#allocation7 + $0x90] sm:$0xf] }
  0x44   :  { %785 = vmatpush.bf16.msrb.mxu2 %v1532_v34  ;;  %v1869_v29 = vld [vmem:[#allocation7 + $0x1e4] sm:$0xf]  ;;  %v1621_v30 = vld [vmem:[#allocation7 + $0x1e8] sm:$0xf0]  ;;  %v1560_v31 = vor.u32 %v1853_v27, %v1557_v28  ;;  %v1828_v34 = vld [vmem:[#allocation7 + $0x94] sm:$0xf0] }
  0x45   :  { %798 = vmatpush.bf16.msrb.mxu3 %v1596_v43  ;;  %761 = vmatpush.bf16.msra.mxu0 %v1388_v49  ;;  %v1624_v32 = vor.u32 %v1869_v29, %v1621_v30  ;;  %v1452_v35 = vor.u32 %v1828_v34, %v1451_v33  ;;  %v1817_v36 = vld [vmem:[#allocation7 + $0x44] sm:$0xf]  ;;  %v1413_v37 = vld [vmem:[#allocation7 + $0x48] sm:$0xf0]  ;;  %v1851_v39 = vld [vmem:[#allocation7 + $0x154] sm:$0xf] }
  0x46   :  { %v1416_v38 = vor.u32 %v1817_v36, %v1413_v37  ;;  %v1867_v42 = vld [vmem:[#allocation7 + $0x1d4] sm:$0xf]  ;;  %v1613_v43 = vld [vmem:[#allocation7 + $0x1d8] sm:$0xf0]  ;;  %v1443_v45 = vld [vmem:[#allocation7 + $0x80] sm:$0xf] }
  0x47   :  { %769 = vmatpush.bf16.msra.mxu1 %v1492_v40  ;;  %v1549_v40 = vld [vmem:[#allocation7 + $0x158] sm:$0xf0]  ;;  %v1616_v44 = vor.u32 %v1867_v42, %v1613_v43  ;;  %v1815_v48 = vld [vmem:[#allocation7 + $0x34] sm:$0xf]  ;;  %v1849_v54 = vld [vmem:[#allocation7 + $0x144] sm:$0xf] }
  0x48   :  { %786 = vmatpush.bf16.msrb.mxu2 %v1524_v46  ;;  %v1552_v41 = vor.u32 %v1851_v39, %v1549_v40  ;;  %v1826_v46 = vld [vmem:[#allocation7 + $0x84] sm:$0xf0]  ;;  %v1405_v49 = vld [vmem:[#allocation7 + $0x38] sm:$0xf0]  ;;  %v1839_v50 = vld [vmem:[#allocation7 + $0xf4] sm:$0xf] }
  0x49   :  { %799 = vmatpush.bf16.msrb.mxu3 %v1588_v57  ;;  %762 = vmatpush.bf16.msra.mxu0 %v1380_v51  ;;  %v1444_v47 = vor.u32 %v1826_v46, %v1443_v45  ;;  %v1408_v52 = vor.u32 %v1815_v48, %v1405_v49  ;;  %v1541_v55 = vld [vmem:[#allocation7 + $0x148] sm:$0xf0]  ;;  %v1865_v58 = vld [vmem:[#allocation7 + $0x1c4] sm:$0xf]  ;;  %v1533_v3 = vld [vmem:[#allocation7 + $0x138] sm:$0xf0] }
  0x4a   :  { %v1544_v57 = vor.u32 %v1849_v54, %v1541_v55  ;;  %v1605_v59 = vld [vmem:[#allocation7 + $0x1c8] sm:$0xf0]  ;;  %v1837_v51 = vld [vmem:[#allocation7 + $0xe4] sm:$0xf]  ;;  %v1597_v6 = vld [vmem:[#allocation7 + $0x1b8] sm:$0xf0] }
  0x4b   :  { %770 = vmatpush.bf16.msra.mxu1 %v1484_v53  ;;  %v1501_v53 = vld [vmem:[#allocation7 + $0xf8] sm:$0xf0]  ;;  %v1608_v60 = vor.u32 %v1865_v58, %v1605_v59  ;;  %v1397_v62 = vld [vmem:[#allocation7 + $0x28] sm:$0xf0]  ;;  %v1835_v11 = vld [vmem:[#allocation7 + $0xd4] sm:$0xf] }
  0x4c   :  { %787 = vmatpush.bf16.msrb.mxu2 %v1516_v61  ;;  %v1504_v56 = vor.u32 %v1839_v50, %v1501_v53  ;;  %v1813_v61 = vld [vmem:[#allocation7 + $0x24] sm:$0xf]  ;;  %v1389_v9 = vld [vmem:[#allocation7 + $0x18] sm:$0xf0]  ;;  %v1525_v15 = vld [vmem:[#allocation7 + $0x128] sm:$0xf0] }
  0x4d   :  { %807 = vmatpush.bf16.msrb.mxu0 %v1440_v1  ;;  %800 = vmatpush.bf16.msrb.mxu3 %v1580_v2  ;;  %v1400_v63 = vor.u32 %v1813_v61, %v1397_v62  ;;  %v1847_v2 = vld [vmem:[#allocation7 + $0x134] sm:$0xf]  ;;  %v1845_v14 = vld [vmem:[#allocation7 + $0x124] sm:$0xf]  ;;  %v1589_v18 = vld [vmem:[#allocation7 + $0x1a8] sm:$0xf0] }
  0x4e   :  { %v1536_v4 = vor.u32 %v1847_v2, %v1533_v3  ;;  %v2262_v19 = vld [vmem:[#allocation5] sm:$0x77]  ;;  %v1381_v22 = vld [vmem:[#allocation7 + $0x8] sm:$0xf0]  ;;  %v1517_v28 = vld [vmem:[#allocation7 + $0x118] sm:$0xf0] }
  0x4f   :  { %771 = vmatpush.bf16.msra.mxu1 %v1476_v0  ;;  %v1493_v0 = vld [vmem:[#allocation7 + $0xe8] sm:$0xf0]  ;;  %v1843_v27 = vld [vmem:[#allocation7 + $0x114] sm:$0xf]  ;;  %v175_v30 = vperm.slane %v2262_v19, 0  ;;  %v327_v46 = vperm.slane %v2262_v19, 1 }
  0x50   :  { %788 = vmatpush.bf16.msrb.mxu2 %v1508_v12  ;;  %v1496_v1 = vor.u32 %v1837_v51, %v1493_v0  ;;  %v1485_v12 = vld [vmem:[#allocation7 + $0xd8] sm:$0xf0]  ;;  %v1477_v25 = vld [vmem:[#allocation7 + $0xc8] sm:$0xf0]  ;;  %v1859_v29 = vld [vmem:[#allocation7 + $0x194] sm:$0xf] }
  0x51   :  { %808 = vmatpush.bf16.msrb.mxu0 %v1432_v8  ;;  %801 = vmatpush.bf16.msrb.mxu3 %v1572_v16  ;;  %v1811_v8 = vld [vmem:[#allocation7 + $0x14] sm:$0xf]  ;;  %v1488_v13 = vor.u32 %v1835_v11, %v1485_v12  ;;  %v1528_v16 = vor.u32 %v1845_v14, %v1525_v15  ;;  %v155_v33 = vld [vmem:[#allocation5 + $0x8] sm:$0x77]  ;;  %v1509_v39 = vld [vmem:[#allocation7 + $0x108] sm:$0xf0] }
  0x52   :  { %v1392_v10 = vor.u32 %v1811_v8, %v1389_v9  ;;  %v1469_v36 = vld [vmem:[#allocation7 + $0xb8] sm:$0xf0]  ;;  %v1857_v40 = vld [vmem:[#allocation7 + $0x184] sm:$0xf]  ;;  %v1573_v42 = vld [vmem:[#allocation7 + $0x188] sm:$0xf0] }
  0x53   :  { %772 = vmatpush.bf16.msra.mxu1 %v1468_v5  ;;  %v1863_v5 = vld [vmem:[#allocation7 + $0x1b4] sm:$0xf]  ;;  %v1829_v43 = vld [vmem:[#allocation7 + $0xa4] sm:$0xf]  ;;  %v183_v45 = vperm.slane %v175_v30, 0  ;;  %v177_v48 = vperm.slane %v155_v33, 0 }
  0x54   :  { %833 = vmatpush.bf16.msra.mxu2 %v1568_v17  ;;  %v1600_v7 = vor.u32 %v1863_v5, %v1597_v6  ;;  %v1861_v17 = vld [vmem:[#allocation7 + $0x1a4] sm:$0xf]  ;;  %v178_v49 = vperm.slane %v155_v33, 4  ;;  %v343_v50 = vperm.slane %v2262_v19, 2  ;;  %v335_v55 = vperm.slane %v327_v46, 1  ;;  %v1875_v46 = vld [vmem:[#allocation8 + $0x10] sm:$0xff] }
  0x55   :  { %846 = vmatpush.bf16.msra.mxu3 %v1632_v21  ;;  %809 = vmatpush.bf16.msrb.mxu0 %v1424_v26  ;;  %v1592_v20 = vor.u32 %v1861_v17, %v1589_v18  ;;  %v1809_v21 = vld [vmem:[#allocation7 + $0x4] sm:$0xf]  ;;  %v1453_v58 = vld [vmem:[#allocation7 + $0x98] sm:$0xf0]  ;;  %v330_v51 = vperm.slane %v155_v33, 5  ;;  %v345_v3 = vperm.slane %v155_v33, 2 }
  0x56   :  { %v1384_v23 = vor.u32 %v1809_v21, %v1381_v22  ;;  %v351_v61 = vperm.slane %v343_v50, 2  ;;  %v1825_v0 = vld [vmem:[#allocation7 + $0x84] sm:$0xf]  ;;  %v176_v15 = vperm.slane %v2262_v19, 4  ;;  %s1294_s14 = sshll.u32 %s2145_s30, 4  ;;  %s1296_s1 = sshll.u32 %s2301_s13, 4  ;;  %s1295_s14 = int_to_ptr.vmem [resolvable:$true] %s1294_s14  ;;  %s1297_s1 = int_to_ptr.hbm [resolvable:$true] %s1296_s1 }
  0x57   :  { %773 = vmatpush.bf16.msra.mxu1 %v1460_v24  ;;  %v1833_v24 = vld [vmem:[#allocation7 + $0xc4] sm:$0xf]  ;;  %v338_v12 = vperm.slane %v330_v51, 1  ;;  %v353_v18 = vperm.slane %v345_v3, 2 }
  0x58   :  { %834 = vmatpush.bf16.msra.mxu2 %v1560_v31  ;;  %v1480_v26 = vor.u32 %v1833_v24, %v1477_v25  ;;  %v1520_v31 = vor.u32 %v1843_v27, %v1517_v28  ;;  %v328_v24 = vperm.slane %v2262_v19, 5  ;;  %v1873_v50 = vld [vmem:[#allocation8] sm:$0xff] }
  0x59   :  { %847 = vmatpush.bf16.msra.mxu3 %v1624_v32  ;;  %810 = vmatpush.bf16.msrb.mxu0 %v1416_v38  ;;  %v1581_v32 = vld [vmem:[#allocation7 + $0x198] sm:$0xf0]  ;;  %v1841_v38 = vld [vmem:[#allocation7 + $0x104] sm:$0xf] }
  0x5a   :  { %v1584_v34 = vor.u32 %v1859_v29, %v1581_v32  ;;  %v344_v29 = vperm.slane %v2262_v19, 6  ;;  %v1879_v19 = vld [vmem:[#allocation8 + $0x30] sm:$0xff] }
  0x5b   :  { %774 = vmatpush.bf16.msra.mxu1 %v1452_v35  ;;  %v1831_v35 = vld [vmem:[#allocation7 + $0xb4] sm:$0xf] }
  0x5c   :  { %835 = vmatpush.bf16.msra.mxu2 %v1552_v41  ;;  %v1472_v37 = vor.u32 %v1831_v35, %v1469_v36  ;;  %v1512_v41 = vor.u32 %v1841_v38, %v1509_v39  ;;  %v352_v36 = vperm.slane %v344_v29, 2 }
  0x5d   :  { %848 = vmatpush.bf16.msra.mxu3 %v1616_v44  ;;  %811 = vmatpush.bf16.msrb.mxu0 %v1408_v52  ;;  %v1461_v44 = vld [vmem:[#allocation7 + $0xa8] sm:$0xf0] }
  0x5e   :  { %v1464_v52 = vor.u32 %v1829_v43, %v1461_v44  ;;  %v1877_v43 = vld [vmem:[#allocation8 + $0x20] sm:$0xff]  ;;  %v1876_v44 = vld [vmem:[#allocation8 + $0x18] sm:$0xff] }
  0x5f   :  { %775 = vmatpush.bf16.msra.mxu1 %v1444_v47  ;;  %v1576_v47 = vor.u32 %v1857_v40, %v1573_v42  ;;  %v1878_v42 = vld [vmem:[#allocation8 + $0x28] sm:$0xff] }
  0x60   :  { %836 = vmatpush.bf16.msra.mxu2 %v1544_v57  ;;  %v1827_v57 = vld [vmem:[#allocation7 + $0x94] sm:$0xf] }
  0x61   :  { %849 = vmatpush.bf16.msra.mxu3 %v1608_v60  ;;  %812 = vmatpush.bf16.msrb.mxu0 %v1400_v63  ;;  %v186_v60 = vperm.slane %v178_v49, 0  ;;  %v1456_v62 = vor.u32 %v1827_v57, %v1453_v58  ;;  %v329_v63 = vperm.slane %v155_v33, 1  ;;  %v1886_v49 = vld [vmem:[#allocation8 + $0x68] sm:$0xff] }
  0x62   :  { %v1882_v58 = vld [vmem:[#allocation8 + $0x48] sm:$0xff] }
  0x63   :  { %820 = vmatpush.bf16.msrb.mxu1 %v1504_v56  ;;  %v185_v56 = vperm.slane %v177_v48, 0  ;;  %v1874_v48 = vld [vmem:[#allocation8 + $0x8] sm:$0xff] }
  0x64   :  { %837 = vmatpush.bf16.msra.mxu2 %v1536_v4  ;;  %v346_v4 = vperm.slane %v155_v33, 6 }
  0x65   :  { %850 = vmatpush.bf16.msra.mxu3 %v1600_v7  ;;  %813 = vmatpush.bf16.msrb.mxu0 %v1392_v10  ;;  %v337_v10 = vperm.slane %v329_v63, 1 }
  0x67   :  { %821 = vmatpush.bf16.msrb.mxu1 %v1496_v1  ;;  %v1445_v1 = vld [vmem:[#allocation7 + $0x88] sm:$0xf0] }
  0x68   :  { %838 = vmatpush.bf16.msra.mxu2 %v1528_v16  ;;  %v1448_v8 = vor.u32 %v1825_v0, %v1445_v1  ;;  %v1896_v0 = vld [vmem:[#allocation10 + $0x38] sm:$0xff] }
  0x69   :  { %851 = vmatpush.bf16.msra.mxu3 %v1592_v20  ;;  %814 = vmatpush.bf16.msrb.mxu0 %v1384_v23  ;;  %v354_v20 = vperm.slane %v346_v4, 2  ;;  %v184_v23 = vperm.slane %v176_v15, 0 }
  0x6b   :  { %822 = vmatpush.bf16.msrb.mxu1 %v1488_v13 }
  0x6c   :  { %839 = vmatpush.bf16.msra.mxu2 %v1520_v31 }
  0x6d   :  { %852 = vmatpush.bf16.msra.mxu3 %v1584_v34  ;;  %v336_v34 = vperm.slane %v328_v24, 1 }
  0x6f   :  { %823 = vmatpush.bf16.msrb.mxu1 %v1480_v26 }
  0x70   :  { %840 = vmatpush.bf16.msra.mxu2 %v1512_v41  ;;  %v1880_v41 = vld [vmem:[#allocation8 + $0x38] sm:$0xff] }
  0x71   :  { %853 = vmatpush.bf16.msra.mxu3 %v1576_v47  ;;  %v1887_v47 = vld [vmem:[#allocation8 + $0x70] sm:$0xff] }
  0x73   :  { %824 = vmatpush.bf16.msrb.mxu1 %v1472_v37 }
  0x77   :  { %825 = vmatpush.bf16.msrb.mxu1 %v1464_v52  ;;  %v1885_v52 = vld [vmem:[#allocation8 + $0x60] sm:$0xff] }
  0x7b   :  { %826 = vmatpush.bf16.msrb.mxu1 %v1456_v62 }
  0x7f   :  { %827 = vmatpush.bf16.msrb.mxu1 %v1448_v8 }
  0xaf   :  { %v280_v53 = vpop.f32.mrf.mxu1 }
  0xb0   :  { %v281_v54 = vadd.f32 %v280_v53, %v183_v45  ;;  %v1888_v45 = vld [vmem:[#allocation8 + $0x78] sm:$0xff] }
  0xb1   :  { %v1884_v53 = vld [vmem:[#allocation8 + $0x58] sm:$0xff] }
  0xb2   :  { %v323_v59 = vmax.f32 %v281_v54, 0.0 }
  0xb4   :  { %v339_v2 = vmul.f32 %v335_v55, %v323_v59  ;;  %v1883_v55 = vld [vmem:[#allocation8 + $0x50] sm:$0xff] }
  0xb6   :  { %v306_v5 = vpop.f32.mrf.mxu2  ;;  %v355_v7 = vadd.f32 %v351_v61, %v339_v2 }
  0xb7   :  { %v319_v6 = vpop.f32.mrf.mxu3  ;;  %v307_v9 = vadd.f32 %v306_v5, %v185_v56  ;;  %v282_v13 = vpop.f32.mrf.mxu1  ;;  %v359_v56 = vld [vmem:[%s2292_s4] sm:$0x77] }
  0xb8   :  { %v320_v11 = vadd.f32 %v319_v6, %v186_v60  ;;  %v360_v14 = vpack.c.bf16 %v355_v7, %v355_v7  ;;  %v429_v57 = vperm.slane %v359_v56, 0  ;;  %v1881_v60 = vld [vmem:[#allocation8 + $0x40] sm:$0xff]  ;;  %v861_v4 = vperm.slane %v359_v56, 1 }
  0xb9   :  { %v325_v16 = vmax.f32 %v307_v9, 0.0  ;;  %v869_v6 = vperm.slane %v359_v56, 2 }
  0xba   :  { %v326_v17 = vmax.f32 %v320_v11, 0.0  ;;  %763 = vmatmul.bf16.vlgmr.msra.gmra.mxu0 %v360_v14  ;;  %v433_v61 = vperm.slane %v429_v57, 0  ;;  %v865_v8 = vperm.slane %v861_v4, 1  ;;  %v1911_v4 = vld [vmem:[#allocation13 + $0x30] sm:$0xff] }
  0xbb   :  { %v341_v21 = vmul.f32 %v337_v10, %v325_v16  ;;  %1009 = vmatpush.bf16.msra.mxu0 %v1880_v41  ;;  %v873_v13 = vperm.slane %v869_v6, 2  ;;  %v1893_v41 = vld [vmem:[#allocation10 + $0x20] sm:$0xff] }
  0xbc   :  { %v342_v22 = vmul.f32 %v338_v12, %v326_v17  ;;  %v430_v12 = vperm.slane %v359_v56, 4  ;;  %v1909_v6 = vld [vmem:[#allocation13 + $0x20] sm:$0xff] }
  0xbd   :  { %v357_v25 = vadd.f32 %v353_v18, %v341_v21 }
  0xbe   :  { %v358_v26 = vadd.f32 %v354_v20, %v342_v22  ;;  %v308_v27 = vpop.f32.mrf.mxu2  ;;  %v434_v17 = vperm.slane %v430_v12, 0 }
  0xbf   :  { %v321_v28 = vpop.f32.mrf.mxu3  ;;  %v293_v30 = vpop.f32.mrf.mxu1  ;;  %v362_v31 = vpack.c.bf16 %v357_v25, %v357_v25  ;;  %1010 = vmatpush.bf16.msra.mxu0 %v1879_v19  ;;  %v1892_v19 = vld [vmem:[#allocation10 + $0x18] sm:$0xff] }
  0xc0   :  { %v363_v32 = vpack.c.bf16 %v358_v26, %v358_v26  ;;  %v294_v33 = vadd.f32 %v293_v30, %v184_v23  ;;  %v862_v26 = vperm.slane %v359_v56, 5  ;;  %v870_v28 = vperm.slane %v359_v56, 6 }
  0xc1   :  { %789 = vmatmul.bf16.vlgmr.msrb.gmra.mxu2 %v362_v31 }
  0xc2   :  { %802 = vmatmul.bf16.vlgmr.msrb.gmra.mxu3 %v363_v32  ;;  %v324_v35 = vmax.f32 %v294_v33, 0.0  ;;  %1109 = vmatpush.bf16.msrb.mxu2 %v1896_v0  ;;  %v866_v30 = vperm.slane %v862_v26, 1 }
  0xc3   :  { %1011 = vmatpush.bf16.msra.mxu0 %v1878_v42  ;;  %v1891_v42 = vld [vmem:[#allocation10 + $0x10] sm:$0xff] }
  0xc4   :  { %v340_v37 = vmul.f32 %v336_v34, %v324_v35  ;;  %v874_v34 = vperm.slane %v870_v28, 2 }
  0xc6   :  { %v356_v38 = vadd.f32 %v352_v36, %v340_v37 }
  0xc7   :  { %v295_v39 = vpop.f32.mrf.mxu1  ;;  %1012 = vmatpush.bf16.msra.mxu0 %v1877_v43  ;;  %v1890_v43 = vld [vmem:[#allocation10 + $0x8] sm:$0xff] }
  0xc8   :  { %v361_v40 = vpack.c.bf16 %v356_v38, %v356_v38  ;;  %v1895_v39 = vld [vmem:[#allocation10 + $0x30] sm:$0xff] }
  0xc9   :  { %1110 = vmatpush.bf16.msrb.mxu2 %v1895_v39 }
  0xca   :  { %776 = vmatmul.bf16.vlgmr.msra.gmra.mxu1 %v361_v40  ;;  %815 = vmatmul.bf16.vlgmr.msrb.gmra.mxu0 %v360_v14 }
  0xcb   :  { %1013 = vmatpush.bf16.msra.mxu0 %v1876_v44  ;;  %1022 = vmatpush.bf16.msra.mxu1 %v1888_v45  ;;  %v1889_v44 = vld [vmem:[#allocation10] sm:$0xff]  ;;  %v1904_v45 = vld [vmem:[#allocation11 + $0x38] sm:$0xff] }
  0xcc   :  { %1192 = vmatpush.bf16.msrb.mxu3 %v1904_v45 }
  0xcf   :  { %1014 = vmatpush.bf16.msra.mxu0 %v1875_v46  ;;  %1023 = vmatpush.bf16.msra.mxu1 %v1887_v47  ;;  %v1903_v46 = vld [vmem:[#allocation11 + $0x30] sm:$0xff] }
  0xd0   :  { %1193 = vmatpush.bf16.msrb.mxu3 %v1903_v46 }
  0xd1   :  { %841 = vmatmul.bf16.vlgmr.msra.gmra.mxu2 %v362_v31 }
  0xd2   :  { %854 = vmatmul.bf16.vlgmr.msra.gmra.mxu3 %v363_v32 }
  0xd3   :  { %1015 = vmatpush.bf16.msra.mxu0 %v1874_v48  ;;  %1024 = vmatpush.bf16.msra.mxu1 %v1886_v49  ;;  %v1902_v48 = vld [vmem:[#allocation11 + $0x28] sm:$0xff]  ;;  %v1901_v49 = vld [vmem:[#allocation11 + $0x20] sm:$0xff] }
  0xd4   :  { %1194 = vmatpush.bf16.msrb.mxu3 %v1902_v48 }
  0xd7   :  { %1016 = vmatpush.bf16.msra.mxu0 %v1873_v50  ;;  %1025 = vmatpush.bf16.msra.mxu1 %v1885_v52  ;;  %v877_v50 = vld [vmem:[%s2294_s6] sm:$0x7] }
  0xd8   :  { %1195 = vmatpush.bf16.msrb.mxu3 %v1901_v49 }
  0xda   :  { %828 = vmatmul.bf16.vlgmr.msrb.gmra.mxu1 %v361_v40  ;;  %v1894_v40 = vld [vmem:[#allocation10 + $0x28] sm:$0xff] }
  0xdb   :  { %1026 = vmatpush.bf16.msra.mxu1 %v1884_v53  ;;  %1111 = vmatpush.bf16.msrb.mxu2 %v1894_v40  ;;  %v1900_v53 = vld [vmem:[#allocation11 + $0x18] sm:$0xff] }
  0xdc   :  { %1196 = vmatpush.bf16.msrb.mxu3 %v1900_v53 }
  0xdf   :  { %1027 = vmatpush.bf16.msra.mxu1 %v1883_v55  ;;  %1112 = vmatpush.bf16.msrb.mxu2 %v1893_v41  ;;  %v1899_v55 = vld [vmem:[#allocation11 + $0x10] sm:$0xff] }
  0xe0   :  { %1197 = vmatpush.bf16.msrb.mxu3 %v1899_v55 }
  0xe3   :  { %1028 = vmatpush.bf16.msra.mxu1 %v1882_v58  ;;  %1113 = vmatpush.bf16.msrb.mxu2 %v1892_v19 }
  0xe7   :  { %1029 = vmatpush.bf16.msra.mxu1 %v1881_v60  ;;  %1114 = vmatpush.bf16.msrb.mxu2 %v1891_v42 }
  0xeb   :  { %1115 = vmatpush.bf16.msrb.mxu2 %v1890_v43 }
  0xef   :  { %1116 = vmatpush.bf16.msrb.mxu2 %v1889_v44 }
 0x137   :  { %v764_v54 = vpop.f32.mrf.mxu0 }
 0x138   :  { %v765_v51 = vadd.f32 %v764_v54, %v433_v61  ;;  %v912_v54 = vperm.slane %v877_v50, 0  ;;  %v1038_v61 = vperm.slane %v877_v50, 2 }
 0x13f   :  { %v766_v59 = vpop.f32.mrf.mxu0 }
 0x140   :  { %v1036_v59 = vperm.slane %v877_v50, 1 }
 0x144   :  { %v790_v62 = vpop.f32.mrf.mxu2 }
 0x145   :  { %v803_v63 = vpop.f32.mrf.mxu3 }
 0x147   :  { %v777_v1 = vpop.f32.mrf.mxu1  ;;  %v816_v2 = vpop.f32.mrf.mxu0 }
 0x148   :  { %v778_v3 = vadd.f32 %v777_v1, %v765_v51  ;;  %v817_v23 = vadd.f32 %v816_v2, %v434_v17  ;;  %v1898_v1 = vld [vmem:[#allocation11 + $0x8] sm:$0xff]  ;;  %v1897_v2 = vld [vmem:[#allocation11] sm:$0xff]  ;;  %v1928_v17 = vld [vmem:[%s2298_s10] ss:$0 sm:$0xff] }
 0x149   :  { %1198 = vmatpush.bf16.msrb.mxu3 %v1898_v1 }
 0x14a   :  { %v791_v5 = vadd.f32 %v790_v62, %v778_v3  ;;  %v1912_v3 = vld [vmem:[#allocation13 + $0x38] sm:$0xff] }
 0x14b   :  { %1275 = vmatpush.bf16.msrb.mxu0 %v1912_v3 }
 0x14c   :  { %v804_v7 = vadd.f32 %v803_v63, %v791_v5  ;;  %v792_v9 = vpop.f32.mrf.mxu2  ;;  %v1910_v5 = vld [vmem:[#allocation13 + $0x28] sm:$0xff] }
 0x14d   :  { %v805_v10 = vpop.f32.mrf.mxu3  ;;  %1199 = vmatpush.bf16.msrb.mxu3 %v1897_v2  ;;  %v1927_v9 = vld [vmem:[%s2296_s8] ss:$0 sm:$0xff] }
 0x14e   :  { %v859_v11 = vmax.f32 %v804_v7, 0.0  ;;  %v1908_v7 = vld [vmem:[#allocation13 + $0x18] sm:$0xff] }
 0x14f   :  { %v779_v14 = vpop.f32.mrf.mxu1  ;;  %v818_v15 = vpop.f32.mrf.mxu0  ;;  %1276 = vmatpush.bf16.msrb.mxu0 %v1911_v4 }
 0x150   :  { %v867_v16 = vmul.f32 %v865_v8, %v859_v11  ;;  %v1907_v8 = vld [vmem:[#allocation13 + $0x10] sm:$0xff]  ;;  %v1906_v15 = vld [vmem:[#allocation13 + $0x8] sm:$0xff] }
 0x152   :  { %v875_v18 = vadd.f32 %v873_v13, %v867_v16  ;;  %v1905_v16 = vld [vmem:[#allocation13] sm:$0xff] }
 0x153   :  { %1277 = vmatpush.bf16.msrb.mxu0 %v1910_v5 }
 0x154   :  { %v842_v20 = vpop.f32.mrf.mxu2  ;;  %v878_v22 = vpack.c.bf16 %v875_v18, %v875_v18 }
 0x155   :  { %v855_v21 = vpop.f32.mrf.mxu3 }
 0x156   :  { %1017 = vmatmul.bf16.vlgmr.msra.gmra.mxu0 %v878_v22 }
 0x157   :  { %v829_v24 = vpop.f32.mrf.mxu1  ;;  %1278 = vmatpush.bf16.msrb.mxu0 %v1909_v6 }
 0x158   :  { %v830_v25 = vadd.f32 %v829_v24, %v817_v23  ;;  %v1929_v24 = vld [vmem:[%s2300_s12] ss:$0 sm:$0xff] }
 0x15a   :  { %v843_v27 = vadd.f32 %v842_v20, %v830_v25 }
 0x15b   :  { %1279 = vmatpush.bf16.msrb.mxu0 %v1908_v7 }
 0x15c   :  { %v856_v29 = vadd.f32 %v855_v21, %v843_v27  ;;  %v844_v31 = vpop.f32.mrf.mxu2 }
 0x15d   :  { %v857_v32 = vpop.f32.mrf.mxu3 }
 0x15e   :  { %v860_v33 = vmax.f32 %v856_v29, 0.0 }
 0x15f   :  { %v831_v35 = vpop.f32.mrf.mxu1  ;;  %1280 = vmatpush.bf16.msrb.mxu0 %v1907_v8 }
 0x160   :  { %v868_v36 = vmul.f32 %v866_v30, %v860_v33 }
 0x162   :  { %v876_v37 = vadd.f32 %v874_v34, %v868_v36 }
 0x163   :  { %1281 = vmatpush.bf16.msrb.mxu0 %v1906_v15 }
 0x164   :  { %v879_v38 = vpack.c.bf16 %v876_v37, %v876_v37 }
 0x166   :  { %1030 = vmatmul.bf16.vlgmr.msra.gmra.mxu1 %v879_v38 }
 0x167   :  { %1282 = vmatpush.bf16.msrb.mxu0 %v1905_v16 }
 0x1d3   :  { %v1018_v47 = vpop.f32.mrf.mxu0 }
 0x1d4   :  { %v1019_v56 = vadd.f32 %v1018_v47, %v912_v54 }
 0x1db   :  { %v1020_v52 = vpop.f32.mrf.mxu0 }
 0x1e3   :  { %v1031_v57 = vpop.f32.mrf.mxu1 }
 0x1e4   :  { %v1032_v58 = vadd.f32 %v1031_v57, %v1019_v56 }
 0x1e6   :  { %v1035_v60 = vmax.f32 %v1032_v58, 0.0 }
 0x1e8   :  { %v1037_v62 = vmul.f32 %v1036_v59, %v1035_v60 }
 0x1ea   :  { %v1039_v63 = vadd.f32 %v1038_v61, %v1037_v62 }
 0x1eb   :  { %v1033_v51 = vpop.f32.mrf.mxu1 }
 0x1ec   :  { %v1040_v0 = vpack.c.bf16 %v1039_v63, %v1039_v63 }
 0x1ee   :  { %1117 = vmatmul.bf16.vlgmr.msrb.gmra.mxu2 %v1040_v0 }
 0x271   :  { %v1118_v10 = vpop.f32.mrf.mxu2 }
 0x272   :  { %v1119_v11 = vadd.f32 %v1927_v9, %v1118_v10 }
 0x274   :  { %v1122_v12 = vmax.f32 %v1119_v11, 0.0 }
 0x276   :  { %v1123_v13 = vpack.c.bf16 %v1122_v12, %v1122_v12 }
 0x278   :  { %1200 = vmatmul.bf16.vlgmr.msrb.gmra.mxu3 %v1123_v13 }
 0x279   :  { %v1120_v14 = vpop.f32.mrf.mxu2 }
 0x2fb   :  { %v1201_v18 = vpop.f32.mrf.mxu3 }
 0x2fc   :  { %v1202_v20 = vadd.f32 %v1928_v17, %v1201_v18 }
 0x2fe   :  { %v1205_v21 = vmax.f32 %v1202_v20, 0.0 }
 0x300   :  { %v1206_v22 = vpack.c.bf16 %v1205_v21, %v1205_v21 }
 0x302   :  { %1283 = vmatmul.bf16.vlgmr.msrb.gmra.mxu0 %v1206_v22 }
 0x303   :  { %v1203_v23 = vpop.f32.mrf.mxu3 }
 0x37f   :  { %v1284_v25 = vpop.f32.mrf.mxu0 }
 0x380   :  { %v1285_v26 = vadd.f32 %v1929_v24, %v1284_v25 }
 0x382   :  { %1288 = vst [vmem:[#allocation14] sm:$0x3] %v1285_v26 }
 0x383   :  { %1299 = dma.vmem_to_hbm [thread:$0]  %s1295_s14, 32, %s1297_s1, [#allocation4]  }
 0x387   :  { %v1286_v27 = vpop.f32.mrf.mxu0 }
 0x388   :  { %2130 = dma.done.wait [#allocation4], 32  }
 0x389   :  { %2131 = vsyncadd [#allocation4], 4294967264 }
 0x38a   :  { %1304 = vsyncpa [#allocation3], 1 }
 0x38b   :  { %1305 = vsyncpa [#allocation6], 1 }
 0x38c   :  { %1306 = vsyncpa [#allocation9], 1 }
 0x38d   :  { %1307 = vsyncpa [#allocation12], 1 }
 0x38e   :  { %1308 = vsyncpa [#allocation4], 1 }

</bundles_post_ra>
